<compile_context>
chip_gen: v6e
topology: v6e:2x2x1
jax: 0.10.0
libtpu: 0.0.40
codegen_flags: <defaults>
</compile_context>

<pallas_src>
import functools

import jax
import jax.numpy as jnp
from jax import lax
from jax.experimental import pallas as pl
from jax.experimental.pallas import tpu as pltpu


def _round_up(x: int, m: int) -> int:
    return ((x + m - 1) // m) * m


def _vmem_capacity_bytes() -> int:
    try:
        return int(pltpu.get_tpu_info().vmem_capacity_bytes)
    except Exception:
        return 64 << 20          # conservative fallback (v7x per-TensorCore)


def _has_bf16_vpu() -> bool:
    # v2-v5 have no bf16 VPU/EUP; v6e / v7x do.
    try:
        kind = jax.devices()[0].device_kind.lower()
    except Exception:
        return False
    return not any(v in kind for v in ("v2", "v3", "v4", "v5"))


def _bahdanau_kernel(hs_ref, ht_ref, wq_ref, bq_ref, wk_ref, bk_ref,
                     wv_ref, bv_ref, wc_ref, bc_ref,
                     c_ref, attn_ref, e_scratch,
                     *, s_len, s_chunk, compute_dtype):
    # One grid step = one batch tile, all decoder directions D at once.
    TB, s_pad, E = hs_ref.shape
    D, _, dh = ht_ref.shape
    dh_pad = wq_ref.shape[1]
    n_chunks = s_pad // s_chunk

    # ---- query projection once per tile (D*TB rows fold onto the MXU M dim) ----
    qp = jnp.dot(ht_ref[...].reshape(D * TB, dh), wq_ref[...],
                 preferred_element_type=jnp.float32)
    qp = qp.reshape(D, TB, dh_pad) + bq_ref[...]                    # (D, TB, dh_pad) f32
    qp_cd = qp.astype(compute_dtype)                                # hoisted cast

    # Hoisted loop-invariant operands (no per-chunk reloads / broadcast replays).
    wk = wk_ref[...]                                                # (E, dh_pad) storage dtype
    bk = bk_ref[...]                                                # (1, dh_pad) f32
    wv_cd = wv_ref[...].astype(compute_dtype)                       # (1, dh_pad)
    bv = bv_ref[0, 0]                                               # scalar f32

    # ---- energies streamed over S chunks; only e (D,TB,s_pad) stays resident ----
    def energy_chunk(j, carry):
        off = pl.multiple_of(j * s_chunk, s_chunk)
        hs_c = hs_ref[:, pl.ds(off, s_chunk), :]                    # (TB, s_chunk, E)
        kp = jnp.dot(hs_c.reshape(TB * s_chunk, E), wk,
                     preferred_element_type=jnp.float32)
        kp = (kp.reshape(TB, s_chunk, dh_pad) + bk).astype(compute_dtype)
        t = jnp.tanh(qp_cd[:, :, None, :] + kp[None])               # (D,TB,s_chunk,dh_pad)
        e_c = jnp.sum(t * wv_cd, axis=-1, dtype=jnp.float32) + bv   # f32 dh-reduction
        e_scratch[:, :, pl.ds(off, s_chunk)] = e_c
        return carry

    lax.fori_loop(0, n_chunks, energy_chunk, 0, unroll=(n_chunks <= 4))

    # ---- mask S padding to -inf, softmax over source positions (f32) ----
    e = e_scratch[...]
    if s_pad > s_len:
        pos = lax.broadcasted_iota(jnp.int32, (1, 1, s_pad), 2)
        e = jnp.where(pos < s_len, e, -jnp.inf)
    m = jnp.max(e, axis=-1, keepdims=True)
    p = jnp.exp(e - m)
    attn = p / jnp.sum(p, axis=-1, keepdims=True)                   # (D, TB, s_pad) f32
    attn_ref[...] = attn.astype(attn_ref.dtype)                     # full-width lane-dense vst

    # ---- context on the MXU + output projection (lane-dense dh_pad) ----
    hs = hs_ref[...]
    ctx = jnp.einsum('dbs,bse->dbe', attn.astype(hs.dtype), hs,
                     preferred_element_type=jnp.float32)            # (D, TB, E) f32
    c = jnp.dot(ctx.reshape(D * TB, E).astype(wc_ref.dtype), wc_ref[...],
                preferred_element_type=jnp.float32)
    c_ref[...] = (c.reshape(D, TB, dh_pad) + bc_ref[...]).astype(c_ref.dtype)


def bahdanau_attention(hs, ht, params, *, dtype=jnp.float32, block_b=None,
                       s_chunk=None, compute_dtype=None):
    """hs: (B, S, E), ht: (D, B, dh) -> (c (D, B, dh) f32, attn (D, B, S) f32).

    `dtype` is the storage / MXU-operand dtype for hs, ht and the projection
    weights (bfloat16 recommended on v6e/v7x).  Accumulation, biases and the
    softmax stay f32; the tanh middle section uses bf16 only on chips with a
    bf16 VPU/EUP.
    """
    B, S, E = hs.shape
    D, B2, dh = ht.shape
    assert B2 == B
    wq, bq, wk, bk, wv_t, bv, wc, bc = params

    dtype = jnp.dtype(dtype)
    isz = dtype.itemsize
    f32 = jnp.float32

    if compute_dtype is None:
        if dtype == jnp.dtype(jnp.bfloat16) and _has_bf16_vpu():
            compute_dtype = jnp.bfloat16
        else:
            compute_dtype = jnp.float32
    csz = jnp.dtype(compute_dtype).itemsize

    # Lane-dense padded widths and S-chunk size (chunk divides s_pad).
    dh_pad = _round_up(dh, 128)
    s_pad = _round_up(S, 128)
    if s_chunk is None:
        s_chunk = next(c for c in (512, 384, 256, 128) if s_pad % c == 0)
    else:
        s_chunk = _round_up(max(min(int(s_chunk), s_pad), 128), 128)
        s_pad = _round_up(s_pad, s_chunk)

    vmem_cap = _vmem_capacity_bytes()

    # ---- batch-tile selection: dtype-aware sublane multiple, VMEM-bounded, ----
    # ---- prefer >= 2 grid steps so the "parallel" axis can use both cores. ----
    sub = {4: 8, 2: 16, 1: 32}.get(isz, 8)
    if block_b is None:
        block_b = 256                     # MXU M fill target for D*tb rows
    row_bytes = (2 * (s_pad * E * isz + D * dh * isz + D * (dh_pad + s_pad) * 4)
                 + 4 * D * s_pad * 4
                 + D * s_chunk * dh_pad * (2 * csz + 8)
                 + s_chunk * dh_pad * 4
                 + D * E * 4)
    budget = max(vmem_cap // 2, 8 << 20)
    cands = [t for t in range(sub, min(B, block_b) + 1, sub)
             if B % t == 0 and t * row_bytes <= budget]
    if cands:
        multi = [t for t in cands if B // t >= 2]
        tb = max(multi) if multi else max(cands)
    else:
        # Full batch as one tile (block == full dim is always legal).
        # TODO(synk): pad B to a sublane multiple for very large, non-divisible B.
        tb = B
    n_blk = B // tb

    # ---- parameter / input prep: zero-pad dh -> dh_pad and S -> s_pad ----
    hs_s = hs.astype(dtype)
    if s_pad > S:
        hs_s = jnp.zeros((B, s_pad, E), dtype).at[:, :S, :].set(hs_s)
    ht_s = ht.astype(dtype)

    def pad_w(w):      # (in, dh) -> (in, dh_pad), storage dtype
        return jnp.zeros((w.shape[0], dh_pad), dtype).at[:, :dh].set(w.astype(dtype))

    def pad_b(b):      # (1, dh) -> (1, dh_pad), f32
        return jnp.zeros((1, dh_pad), f32).at[:, :dh].set(b.astype(f32))

    wq_p, wk_p, wc_p = pad_w(wq), pad_w(wk), pad_w(wc)
    bq_p, bk_p, bc_p = pad_b(bq), pad_b(bk), pad_b(bc)
    wv_p = pad_b(wv_t)                    # zero padding keeps e exact
    bv_f = bv.astype(f32)

    # ---- scoped-VMEM limit from the per-step footprint, capped below physical ----
    weights_bytes = 2 * (dh + 3 * E + 4) * dh_pad * 4
    blk_bytes = 2 * (tb * s_pad * E * isz + D * tb * dh * isz)
    out_bytes = 2 * D * tb * (dh_pad + s_pad) * 4
    scratch_bytes = D * tb * s_pad * 4
    interm_bytes = (D * tb * s_chunk * dh_pad * (2 * csz + 4)
                    + tb * s_chunk * dh_pad * 4
                    + D * tb * dh_pad * 8
                    + 3 * D * tb * s_pad * 4
                    + D * tb * E * 4)
    vmem_limit = (blk_bytes + weights_bytes + out_bytes + scratch_bytes
                  + interm_bytes + (8 << 20))
    vmem_limit = max(vmem_limit, 16 << 20)
    vmem_limit = int(min(vmem_limit, max(vmem_cap - (8 << 20), 16 << 20)))

    in_specs = [
        pl.BlockSpec((tb, s_pad, E), lambda i: (i, 0, 0)),        # hs batch tile (S-padded)
        pl.BlockSpec((D, tb, dh), lambda i: (0, i, 0)),           # ht batch tile (all D)
        pl.BlockSpec((dh, dh_pad), lambda i: (0, 0)),             # Wq (padded)
        pl.BlockSpec((1, dh_pad), lambda i: (0, 0)),              # bq
        pl.BlockSpec((E, dh_pad), lambda i: (0, 0)),              # Wk (padded)
        pl.BlockSpec((1, dh_pad), lambda i: (0, 0)),              # bk
        pl.BlockSpec((1, dh_pad), lambda i: (0, 0)),              # wv (transposed, padded)
        pl.BlockSpec((1, 1), lambda i: (0, 0)),                   # bv
        pl.BlockSpec((E, dh_pad), lambda i: (0, 0)),              # Wc (padded)
        pl.BlockSpec((1, dh_pad), lambda i: (0, 0)),              # bc
    ]
    out_specs = (
        pl.BlockSpec((D, tb, dh_pad), lambda i: (0, i, 0)),       # context (padded)
        pl.BlockSpec((D, tb, s_pad), lambda i: (0, i, 0)),        # attention (padded)
    )
    out_shape = (
        jax.ShapeDtypeStruct((D, B, dh_pad), jnp.float32),
        jax.ShapeDtypeStruct((D, B, s_pad), jnp.float32),
    )

    kernel = functools.partial(_bahdanau_kernel, s_len=S, s_chunk=s_chunk,
                               compute_dtype=compute_dtype)

    c_pad, attn_pad = pl.pallas_call(
        kernel,
        out_shape=out_shape,
        grid=(n_blk,),
        in_specs=in_specs,
        out_specs=out_specs,
        scratch_shapes=[pltpu.VMEM((D, tb, s_pad), jnp.float32)],
        compiler_params=pltpu.CompilerParams(
            dimension_semantics=("parallel",),
            vmem_limit_bytes=vmem_limit),
    )(hs_s, ht_s, wq_p, bq_p, wk_p, bk_p, wv_p, bv_f, wc_p, bc_p)

    # Slice off the lane padding.
    return c_pad[:, :, :dh], attn_pad[:, :, :S]


def reference(hs, ht, params):
    """Pure-JAX reference mirroring the PyTorch forward exactly (f32)."""
    wq, bq, wk, bk, wv_t, bv, wc, bc = params
    q = jnp.einsum('dbh,hk->dbk', ht, wq) + bq[0]             # (D, B, dh)
    k = jnp.einsum('bse,ek->bsk', hs, wk) + bk[0]             # (B, S, dh)
    t = jnp.tanh(q[:, :, None, :] + k[None])                  # (D, B, S, dh)
    e = jnp.einsum('dbsk,k->dbs', t, wv_t[0]) + bv[0, 0]      # (D, B, S)
    attn = jax.nn.softmax(e, axis=-1)
    c = jnp.einsum('dbs,bsg->dbg', attn, hs)                  # (D, B, E)
    c = jnp.einsum('dbg,gk->dbk', c, wc) + bc[0]              # (D, B, dh)
    return c, attn


if __name__ == "__main__":
    def make_params(key, E, dh, scale=0.1):
        ks = jax.random.split(key, 8)
        wq = scale * jax.random.normal(ks[0], (dh, dh), jnp.float32)
        bq = scale * jax.random.normal(ks[1], (1, dh), jnp.float32)
        wk = scale * jax.random.normal(ks[2], (E, dh), jnp.float32)
        bk = scale * jax.random.normal(ks[3], (1, dh), jnp.float32)
        wv_t = scale * jax.random.normal(ks[4], (1, dh), jnp.float32)   # Linear(dh,1) weight^T
        bv = scale * jax.random.normal(ks[5], (1, 1), jnp.float32)
        wc = scale * jax.random.normal(ks[6], (E, dh), jnp.float32)
        bc = scale * jax.random.normal(ks[7], (1, dh), jnp.float32)
        return (wq, bq, wk, bk, wv_t, bv, wc, bc)

    key = jax.random.PRNGKey(0)

    # ---- case 1: module's small shapes, f32 end-to-end (tight tolerance) ----
    D, B, S = 1, 2, 8
    encoder_hidden_dim, decoder_hidden_dim = 32, 32
    E = 1 * encoder_hidden_dim       # encoder_bidirectional = False
    dh = decoder_hidden_dim
    k0, k1, k2 = jax.random.split(key, 3)
    hs = jax.random.normal(k0, (B, S, E), jnp.float32)
    ht = jax.random.normal(k1, (D, B, dh), jnp.float32)
    params = make_params(k2, E, dh)

    c_ref, a_ref = reference(hs, ht, params)
    c, a = jax.block_until_ready(bahdanau_attention(hs, ht, params))
    assert c.shape == (D, B, dh) and a.shape == (D, B, S)
    assert jnp.allclose(c, c_ref, atol=1e-5, rtol=1e-5)
    assert jnp.allclose(a, a_ref, atol=1e-5, rtol=1e-5)
    assert jnp.allclose(jnp.sum(a, axis=-1), 1.0, atol=1e-5)

    # ---- case 2: bf16 storage (f32 accumulation; bf16 tanh only on v6e/v7x) ----
    c16, a16 = jax.block_until_ready(
        bahdanau_attention(hs, ht, params, dtype=jnp.bfloat16))
    assert c16.shape == (D, B, dh) and a16.shape == (D, B, S)
    assert jnp.allclose(c16, c_ref, atol=1e-1, rtol=5e-2)
    assert jnp.allclose(a16, a_ref, atol=1e-1, rtol=5e-2)

    # ---- case 3: non-aligned S / dh, multi-direction, forced 2-chunk S loop ----
    D2, B2, S2, E2, dh2 = 2, 4, 200, 48, 40
    k3, k4, k5 = jax.random.split(jax.random.PRNGKey(1), 3)
    hs2 = jax.random.normal(k3, (B2, S2, E2), jnp.float32)
    ht2 = jax.random.normal(k4, (D2, B2, dh2), jnp.float32)
    params2 = make_params(k5, E2, dh2)
    c2_ref, a2_ref = reference(hs2, ht2, params2)
    c2, a2 = jax.block_until_ready(
        bahdanau_attention(hs2, ht2, params2, s_chunk=128))
    assert c2.shape == (D2, B2, dh2) and a2.shape == (D2, B2, S2)
    assert jnp.allclose(c2, c2_ref, atol=1e-4, rtol=1e-4)
    assert jnp.allclose(a2, a2_ref, atol=1e-4, rtol=1e-4)
    assert jnp.allclose(jnp.sum(a2, axis=-1), 1.0, atol=1e-4)

    print("KERNEL_OK")
</pallas_src>

<mosaic_0001>
module attributes {stable_mosaic.version = 11 : i64} {
  func.func @_bahdanau_kernel(%arg0: i32, %arg1: memref<2x128x32xf32, #tpu.memory_space<vmem>>, %arg2: memref<1x2x32xf32, #tpu.memory_space<vmem>>, %arg3: memref<32x128xf32, #tpu.memory_space<vmem>>, %arg4: memref<1x128xf32, #tpu.memory_space<vmem>>, %arg5: memref<32x128xf32, #tpu.memory_space<vmem>>, %arg6: memref<1x128xf32, #tpu.memory_space<vmem>>, %arg7: memref<1x128xf32, #tpu.memory_space<vmem>>, %arg8: memref<1x1xf32, #tpu.memory_space<vmem>>, %arg9: memref<32x128xf32, #tpu.memory_space<vmem>>, %arg10: memref<1x128xf32, #tpu.memory_space<vmem>>, %arg11: memref<1x2x128xf32, #tpu.memory_space<vmem>>, %arg12: memref<1x2x128xf32, #tpu.memory_space<vmem>>, %arg13: memref<1x2x128xf32, #tpu.memory_space<vmem>>) attributes {dimension_semantics = [#tpu.dimension_semantics<parallel>], iteration_bounds = array<i64: 1>, scalar_prefetch = 0 : i64, scratch_operands = 1 : i64, tpu.core_type = #tpu.core_type<tc>, window_params = [{transform_indices = @transform_0, window_bounds = array<i64: 2, 128, 32>}, {transform_indices = @transform_1, window_bounds = array<i64: 1, 2, 32>}, {pipeline_mode = #tpu.pipeline_mode<synchronous>, transform_indices = @transform_2, window_bounds = array<i64: 32, 128>}, {pipeline_mode = #tpu.pipeline_mode<synchronous>, transform_indices = @transform_3, window_bounds = array<i64: 1, 128>}, {pipeline_mode = #tpu.pipeline_mode<synchronous>, transform_indices = @transform_4, window_bounds = array<i64: 32, 128>}, {pipeline_mode = #tpu.pipeline_mode<synchronous>, transform_indices = @transform_5, window_bounds = array<i64: 1, 128>}, {pipeline_mode = #tpu.pipeline_mode<synchronous>, transform_indices = @transform_6, window_bounds = array<i64: 1, 128>}, {pipeline_mode = #tpu.pipeline_mode<synchronous>, transform_indices = @transform_7, window_bounds = array<i64: 1, 1>}, {pipeline_mode = #tpu.pipeline_mode<synchronous>, transform_indices = @transform_8, window_bounds = array<i64: 32, 128>}, {pipeline_mode = #tpu.pipeline_mode<synchronous>, transform_indices = @transform_9, window_bounds = array<i64: 1, 128>}, {transform_indices = @transform_10, window_bounds = array<i64: 1, 2, 128>}, {transform_indices = @transform_11, window_bounds = array<i64: 1, 2, 128>}]} {
    %c0 = arith.constant 0 : index
    %c0_0 = arith.constant 0 : index
    %c0_1 = arith.constant 0 : index
    %0 = vector.load %arg2[%c0, %c0_0, %c0_1] : memref<1x2x32xf32, #tpu.memory_space<vmem>>, vector<1x2x32xf32>
    %1 = vector.shape_cast %0 : vector<1x2x32xf32> to vector<2x32xf32>
    %c0_2 = arith.constant 0 : index
    %c0_3 = arith.constant 0 : index
    %2 = vector.load %arg3[%c0_2, %c0_3] : memref<32x128xf32, #tpu.memory_space<vmem>>, vector<32x128xf32>
    %cst = arith.constant dense<0.000000e+00> : vector<2x128xf32>
    %3 = tpu.matmul %1, %2, %cst {dimension_numbers = #tpu.dot_dimension_numbers<[1], [0], [0], [1], [0, 0, 1, 1], [], []>} : vector<2x32xf32>, vector<32x128xf32>, vector<2x128xf32> -> vector<2x128xf32>
    %4 = vector.shape_cast %3 : vector<2x128xf32> to vector<1x2x128xf32>
    %c0_4 = arith.constant 0 : index
    %c0_5 = arith.constant 0 : index
    %5 = vector.load %arg4[%c0_4, %c0_5] : memref<1x128xf32, #tpu.memory_space<vmem>>, vector<1x128xf32>
    %6 = vector.shape_cast %5 : vector<1x128xf32> to vector<1x1x128xf32>
    %7 = vector.broadcast %6 : vector<1x1x128xf32> to vector<1x2x128xf32>
    %8 = arith.addf %4, %7 : vector<1x2x128xf32>
    %c0_6 = arith.constant 0 : index
    %c0_7 = arith.constant 0 : index
    %9 = vector.load %arg5[%c0_6, %c0_7] : memref<32x128xf32, #tpu.memory_space<vmem>>, vector<32x128xf32>
    %c0_8 = arith.constant 0 : index
    %c0_9 = arith.constant 0 : index
    %10 = vector.load %arg6[%c0_8, %c0_9] : memref<1x128xf32, #tpu.memory_space<vmem>>, vector<1x128xf32>
    %c0_10 = arith.constant 0 : index
    %c0_11 = arith.constant 0 : index
    %11 = vector.load %arg7[%c0_10, %c0_11] : memref<1x128xf32, #tpu.memory_space<vmem>>, vector<1x128xf32>
    %c0_12 = arith.constant 0 : index
    %c0_13 = arith.constant 0 : index
    %12 = vector.load %arg8[%c0_12, %c0_13] : memref<1x1xf32, #tpu.memory_space<vmem>>, vector<1x1xf32>
    %13 = vector.extract %12[0, 0] : f32 from vector<1x1xf32>
    %c0_i32 = arith.constant 0 : i32
    %c128_i32 = arith.constant 128 : i32
    %14 = arith.muli %c0_i32, %c128_i32 : i32
    %15 = tpu.assume_multiple %14, 128 : i32
    %c0_14 = arith.constant 0 : index
    %16 = arith.index_cast %15 : i32 to index
    %c0_15 = arith.constant 0 : index
    %17 = vector.load %arg1[%c0_14, %16, %c0_15] : memref<2x128x32xf32, #tpu.memory_space<vmem>>, vector<2x128x32xf32>
    %18 = vector.shape_cast %17 : vector<2x128x32xf32> to vector<256x32xf32>
    %cst_16 = arith.constant dense<0.000000e+00> : vector<256x128xf32>
    %19 = tpu.matmul %18, %9, %cst_16 {dimension_numbers = #tpu.dot_dimension_numbers<[1], [0], [0], [1], [0, 0, 1, 1], [], []>} : vector<256x32xf32>, vector<32x128xf32>, vector<256x128xf32> -> vector<256x128xf32>
    %20 = vector.shape_cast %19 : vector<256x128xf32> to vector<2x128x128xf32>
    %21 = vector.shape_cast %10 : vector<1x128xf32> to vector<1x1x128xf32>
    %22 = vector.broadcast %21 : vector<1x1x128xf32> to vector<2x128x128xf32>
    %23 = arith.addf %20, %22 : vector<2x128x128xf32>
    %24 = vector.shape_cast %8 : vector<1x2x128xf32> to vector<1x2x1x128xf32>
    %25 = vector.shape_cast %23 : vector<2x128x128xf32> to vector<1x2x128x128xf32>
    %26 = vector.broadcast %24 : vector<1x2x1x128xf32> to vector<1x2x128x128xf32>
    %27 = arith.addf %26, %25 : vector<1x2x128x128xf32>
    %28 = math.tanh %27 : vector<1x2x128x128xf32>
    %29 = vector.shape_cast %11 : vector<1x128xf32> to vector<1x1x1x128xf32>
    %30 = vector.broadcast %29 : vector<1x1x1x128xf32> to vector<1x2x128x128xf32>
    %31 = arith.mulf %28, %30 : vector<1x2x128x128xf32>
    %cst_17 = arith.constant dense<0.000000e+00> : vector<1x2x128xf32>
    %32 = vector.multi_reduction <add>, %31, %cst_17 [3] : vector<1x2x128x128xf32> to vector<1x2x128xf32>
    %33 = vector.broadcast %13 : f32 to vector<1x2x128xf32>
    %34 = arith.addf %32, %33 : vector<1x2x128xf32>
    %c0_18 = arith.constant 0 : index
    %c0_19 = arith.constant 0 : index
    %35 = arith.index_cast %15 : i32 to index
    %36 = vector.load %arg13[%c0_18, %c0_19, %35] : memref<1x2x128xf32, #tpu.memory_space<vmem>>, vector<1x2x128xf32>
    tpu.vector_store %arg13[%c0_18, %c0_19, %35], %34 {strides = array<i32>} : memref<1x2x128xf32, #tpu.memory_space<vmem>>, vector<1x2x128xf32>,
    %c1_i32 = arith.constant 1 : i32
    %c0_20 = arith.constant 0 : index
    %c0_21 = arith.constant 0 : index
    %c0_22 = arith.constant 0 : index
    %37 = vector.load %arg13[%c0_20, %c0_21, %c0_22] : memref<1x2x128xf32, #tpu.memory_space<vmem>>, vector<1x2x128xf32>
    %38 = tpu.iota {dimensions = array<i32: 2>} : vector<1x1x128xi32>
    %c8_i32 = arith.constant 8 : i32
    %39 = vector.broadcast %c8_i32 : i32 to vector<1x1x128xi32>
    %40 = arith.cmpi slt, %38, %39 : vector<1x1x128xi32>
    %cst_23 = arith.constant 0xFF800000 : f32
    %41 = vector.shape_cast %40 : vector<1x1x128xi1> to vector<1x1x128xi1>
    %42 = vector.broadcast %41 : vector<1x1x128xi1> to vector<1x2x128xi1>
    %43 = vector.broadcast %cst_23 : f32 to vector<1x2x128xf32>
    %44 = arith.select %42, %37, %43 : vector<1x2x128xi1>, vector<1x2x128xf32>
    %cst_24 = arith.constant dense<0xFF800000> : vector<1x2xf32>
    %45 = vector.multi_reduction <maximumf>, %44, %cst_24 [2] : vector<1x2x128xf32> to vector<1x2xf32>
    %46 = vector.shape_cast %45 : vector<1x2xf32> to vector<1x2x1xf32>
    %47 = vector.broadcast %46 : vector<1x2x1xf32> to vector<1x2x128xf32>
    %48 = arith.subf %44, %47 : vector<1x2x128xf32>
    %49 = math.exp %48 : vector<1x2x128xf32>
    %cst_25 = arith.constant dense<0.000000e+00> : vector<1x2xf32>
    %50 = vector.multi_reduction <add>, %49, %cst_25 [2] : vector<1x2x128xf32> to vector<1x2xf32>
    %51 = vector.shape_cast %50 : vector<1x2xf32> to vector<1x2x1xf32>
    %52 = vector.broadcast %51 : vector<1x2x1xf32> to vector<1x2x128xf32>
    %53 = arith.divf %49, %52 : vector<1x2x128xf32>
    %c0_26 = arith.constant 0 : index
    %c0_27 = arith.constant 0 : index
    %c0_28 = arith.constant 0 : index
    %54 = vector.load %arg12[%c0_26, %c0_27, %c0_28] : memref<1x2x128xf32, #tpu.memory_space<vmem>>, vector<1x2x128xf32>
    tpu.vector_store %arg12[%c0_26, %c0_27, %c0_28], %53 {strides = array<i32>} : memref<1x2x128xf32, #tpu.memory_space<vmem>>, vector<1x2x128xf32>,
    %c0_29 = arith.constant 0 : index
    %c0_30 = arith.constant 0 : index
    %c0_31 = arith.constant 0 : index
    %55 = vector.load %arg1[%c0_29, %c0_30, %c0_31] : memref<2x128x32xf32, #tpu.memory_space<vmem>>, vector<2x128x32xf32>
    "tpu.trace_start"() <{level = 10 : i32, message = "dbs,bse->dbe"}> : () -> ()
    %cst_32 = arith.constant dense<0.000000e+00> : vector<2x32x1xf32>
    %56 = tpu.matmul %55, %53, %cst_32 {dimension_numbers = #tpu.dot_dimension_numbers<[1], [2], [2], [0], [0, 0, 0, 2, 1, 0], [0], [1]>} : vector<2x128x32xf32>, vector<1x2x128xf32>, vector<2x32x1xf32> -> vector<2x32x1xf32>
    %57 = tpu.transpose %56, [2, 0, 1] : vector<2x32x1xf32> -> vector<1x2x32xf32>
    "tpu.trace_stop"() : () -> ()
    %58 = vector.shape_cast %57 : vector<1x2x32xf32> to vector<2x32xf32>
    %c0_33 = arith.constant 0 : index
    %c0_34 = arith.constant 0 : index
    %59 = vector.load %arg9[%c0_33, %c0_34] : memref<32x128xf32, #tpu.memory_space<vmem>>, vector<32x128xf32>
    %cst_35 = arith.constant dense<0.000000e+00> : vector<2x128xf32>
    %60 = tpu.matmul %58, %59, %cst_35 {dimension_numbers = #tpu.dot_dimension_numbers<[1], [0], [0], [1], [0, 0, 1, 1], [], []>} : vector<2x32xf32>, vector<32x128xf32>, vector<2x128xf32> -> vector<2x128xf32>
    %61 = vector.shape_cast %60 : vector<2x128xf32> to vector<1x2x128xf32>
    %c0_36 = arith.constant 0 : index
    %c0_37 = arith.constant 0 : index
    %62 = vector.load %arg10[%c0_36, %c0_37] : memref<1x128xf32, #tpu.memory_space<vmem>>, vector<1x128xf32>
    %63 = vector.shape_cast %62 : vector<1x128xf32> to vector<1x1x128xf32>
    %64 = vector.broadcast %63 : vector<1x1x128xf32> to vector<1x2x128xf32>
    %65 = arith.addf %61, %64 : vector<1x2x128xf32>
    %c0_38 = arith.constant 0 : index
    %c0_39 = arith.constant 0 : index
    %c0_40 = arith.constant 0 : index
    %66 = vector.load %arg11[%c0_38, %c0_39, %c0_40] : memref<1x2x128xf32, #tpu.memory_space<vmem>>, vector<1x2x128xf32>
    tpu.vector_store %arg11[%c0_38, %c0_39, %c0_40], %65 {strides = array<i32>} : memref<1x2x128xf32, #tpu.memory_space<vmem>>, vector<1x2x128xf32>,
    return
  }
  func.func @transform_0(%arg0: i32) -> (i32, i32, i32) {
    %c0_i32 = arith.constant 0 : i32
    %c0_i32_0 = arith.constant 0 : i32
    %c0_i32_1 = arith.constant 0 : i32
    return %arg0, %c0_i32, %c0_i32_0 : i32, i32, i32
  }
  func.func @transform_1(%arg0: i32) -> (i32, i32, i32) {
    %c0_i32 = arith.constant 0 : i32
    %c0_i32_0 = arith.constant 0 : i32
    %c0_i32_1 = arith.constant 0 : i32
    return %c0_i32, %arg0, %c0_i32_0 : i32, i32, i32
  }
  func.func @transform_2(%arg0: i32) -> (i32, i32) {
    %c0_i32 = arith.constant 0 : i32
    %c0_i32_0 = arith.constant 0 : i32
    %c0_i32_1 = arith.constant 0 : i32
    return %c0_i32, %c0_i32_0 : i32, i32
  }
  func.func @transform_3(%arg0: i32) -> (i32, i32) {
    %c0_i32 = arith.constant 0 : i32
    %c0_i32_0 = arith.constant 0 : i32
    %c0_i32_1 = arith.constant 0 : i32
    return %c0_i32, %c0_i32_0 : i32, i32
  }
  func.func @transform_4(%arg0: i32) -> (i32, i32) {
    %c0_i32 = arith.constant 0 : i32
    %c0_i32_0 = arith.constant 0 : i32
    %c0_i32_1 = arith.constant 0 : i32
    return %c0_i32, %c0_i32_0 : i32, i32
  }
  func.func @transform_5(%arg0: i32) -> (i32, i32) {
    %c0_i32 = arith.constant 0 : i32
    %c0_i32_0 = arith.constant 0 : i32
    %c0_i32_1 = arith.constant 0 : i32
    return %c0_i32, %c0_i32_0 : i32, i32
  }
  func.func @transform_6(%arg0: i32) -> (i32, i32) {
    %c0_i32 = arith.constant 0 : i32
    %c0_i32_0 = arith.constant 0 : i32
    %c0_i32_1 = arith.constant 0 : i32
    return %c0_i32, %c0_i32_0 : i32, i32
  }
  func.func @transform_7(%arg0: i32) -> (i32, i32) {
    %c0_i32 = arith.constant 0 : i32
    %c0_i32_0 = arith.constant 0 : i32
    %c0_i32_1 = arith.constant 0 : i32
    return %c0_i32, %c0_i32_0 : i32, i32
  }
  func.func @transform_8(%arg0: i32) -> (i32, i32) {
    %c0_i32 = arith.constant 0 : i32
    %c0_i32_0 = arith.constant 0 : i32
    %c0_i32_1 = arith.constant 0 : i32
    return %c0_i32, %c0_i32_0 : i32, i32
  }
  func.func @transform_9(%arg0: i32) -> (i32, i32) {
    %c0_i32 = arith.constant 0 : i32
    %c0_i32_0 = arith.constant 0 : i32
    %c0_i32_1 = arith.constant 0 : i32
    return %c0_i32, %c0_i32_0 : i32, i32
  }
  func.func @transform_10(%arg0: i32) -> (i32, i32, i32) {
    %c0_i32 = arith.constant 0 : i32
    %c0_i32_0 = arith.constant 0 : i32
    %c0_i32_1 = arith.constant 0 : i32
    return %c0_i32, %arg0, %c0_i32_0 : i32, i32, i32
  }
  func.func @transform_11(%arg0: i32) -> (i32, i32, i32) {
    %c0_i32 = arith.constant 0 : i32
    %c0_i32_0 = arith.constant 0 : i32
    %c0_i32_1 = arith.constant 0 : i32
    return %c0_i32, %arg0, %c0_i32_0 : i32, i32, i32
  }
}

</mosaic_0001>

<bundles_post_ra>
// kernel: tpu_custom_call.1
= control target key start
LH: loop header
LB: loop body
LE: loop exit
PB: predicated region body
PF: predicated region fallthrough
CT: control target
= control target key end

     0   :  { %s8824_s0 = inlined_call_operand.vmem [shape: f32[2,128,32], index: 0, kind: input, shape index: {}]   ;;  %s8825_s1 = inlined_call_operand.vmem [shape: f32[1,2,32], index: 1, kind: input, shape index: {}]   ;;  %s8826_s2 = inlined_call_operand.vmem [shape: f32[32,128], index: 2, kind: input, shape index: {}]   ;;  %s8827_s3 = inlined_call_operand.vmem [shape: f32[1,128], index: 3, kind: input, shape index: {}]   ;;  %s8828_s4 = inlined_call_operand.vmem [shape: f32[32,128], index: 4, kind: input, shape index: {}]   ;;  %s8829_s5 = inlined_call_operand.vmem [shape: f32[1,128], index: 5, kind: input, shape index: {}]   ;;  %s8830_s6 = inlined_call_operand.vmem [shape: f32[1,128], index: 6, kind: input, shape index: {}]   ;;  %s8831_s7 = inlined_call_operand.<no memory space> [shape: f32[1,1], index: 7, kind: input, shape index: {}]   ;;  %s8832_s8 = inlined_call_operand.vmem [shape: f32[32,128], index: 8, kind: input, shape index: {}]   ;;  %s8833_s9 = inlined_call_operand.vmem [shape: f32[1,128], index: 9, kind: input, shape index: {}]   ;;  %s8834_s10 = inlined_call_operand.hbm [shape: f32[1,2,128], index: 10, kind: output, shape index: {0}]   ;;  %s8835_s11 = inlined_call_operand.hbm [shape: f32[1,2,128], index: 11, kind: output, shape index: {1}]  }
   0x1   :  { %v17_v0 = vstv %s8831_s7 }
   0x2   :  { %18 = vst [vmem:[#allocation3] sm:$0x1] %v17_v0 }
   0x3   :  { %19 = vsyncpa [#allocation5], 0  ;;  %v131_v1 = vld [vmem:[%s8828_s4 + $0x18] sm:$0xff]  ;;  %v130_v3 = vld [vmem:[%s8828_s4 + $0x10] sm:$0xff]  ;;  %v8836_v4 = vmov 0.0   ;;  %vm46_vm0 = vcmask 261120  }
   0x4   :  { %v45_v2 = vld [vmem:[%s8826_s2 + $0x18] sm:$0xff]  ;;  %7291 = vmatprep.subr.mxu0 %v8836_v4  ;;  %7302 = vmatprep.subr.mxu1 %v131_v1  ;;  %v44_v5 = vld [vmem:[%s8826_s2 + $0x10] sm:$0xff]  ;;  %v129_v6 = vld [vmem:[%s8828_s4 + $0x8] sm:$0xff]  ;;  %vm7619_vm1 = vmmov 0  }
   0x5   :  { %7292 = vmatpush3.msra.mxu0 %v45_v2  ;;  %7303 = vmatpush3.msra.mxu1 %v131_v1  ;;  %v43_v7 = vld [vmem:[%s8826_s2 + $0x8] sm:$0xff]  ;;  %v128_v8 = vld [vmem:[%s8828_s4] sm:$0xff]  ;;  %v138_v13 = vld [vmem:[%s8824_s0 + $0x10] sm:$0xff] }
   0x6   :  { %7293 = vmatprep.subr.mxu0 %v8836_v4  ;;  %7304 = vmatprep.subr.mxu1 %v130_v3  ;;  %v42_v9 = vld [vmem:[%s8826_s2] sm:$0xff]  ;;  %v137_v12 = vld [vmem:[%s8824_s0 + $0x8] sm:$0xff]  ;;  %v139_v14 = vld [vmem:[%s8824_s0 + $0x18] sm:$0xff] }
   0x7   :  { %7294 = vmatpush3.msra.mxu0 %v44_v5  ;;  %7305 = vmatpush3.msra.mxu1 %v130_v3  ;;  %v136_v10 = vld [vmem:[%s8824_s0] sm:$0xff] }
   0x8   :  { %7295 = vmatprep.subr.mxu0 %v8836_v4  ;;  %7306 = vmatprep.subr.mxu1 %v129_v6  ;;  %v41_v11 = vld [vmem:[%s8825_s1] sm:$0x3] }
   0x9   :  { %7296 = vmatpush3.msra.mxu0 %v43_v7  ;;  %7307 = vmatpush3.msra.mxu1 %v129_v6  ;;  %v140_v15 = vld [vmem:[%s8824_s0 + $0x20] sm:$0xff] }
   0xa   :  { %7297 = vmatprep.subr.mxu0 %v8836_v4  ;;  %7308 = vmatprep.subr.mxu1 %v128_v8 }
   0xb   :  { %7298 = vmatpush3.msra.mxu0 %v42_v9  ;;  %7299 = vmatprep.mubr.msk.f32.mxu0 %vm7619_vm1, %v8836_v4 }
   0xc   :  { %7309 = vmatpush3.msra.mxu1 %v128_v8  ;;  %7310 = vmatprep.mubr.msk.f32.mxu1 %vm46_vm0, %v136_v10 }
   0xd   :  { %7300 = vmatmul.mubr.msk.f32.vlgmr.msra.gmra.mxu0 %vm46_vm0, %v41_v11  ;;  %7311 = vmatmul.mubr.msk.f32.vlgmr.msra.gmra.mxu1 %vm46_vm0, %v137_v12 }
   0xe   :  { %7313 = vmatprep.mubr.msk.f32.mxu1 %vm46_vm0, %v138_v13  ;;  %7434 = vmatprep.subr.mxu1 %v8836_v4 }
   0xf   :  { %20 = vsyncpa [#allocation7], 0  ;;  %v141_v16 = vld [vmem:[%s8824_s0 + $0x28] sm:$0xff]  ;;  %v142_v17 = vld [vmem:[%s8824_s0 + $0x30] sm:$0xff]  ;;  %v7620_v44 = vmov 1966171168   ;;  %v531_v46 = vlaneseq }
  0x10   :  { %v143_v18 = vld [vmem:[%s8824_s0 + $0x38] sm:$0xff]  ;;  %v144_v19 = vld [vmem:[%s8824_s0 + $0x40] sm:$0xff]  ;;  %v145_v20 = vld [vmem:[%s8824_s0 + $0x48] sm:$0xff]  ;;  %v529_v45 = vunpack.c.l.s4 %v7620_v44  ;;  %vm802_vm2 = vcmask 130112   ;;  %vm809_vm3 = vcmask 195712   ;;  %vm816_vm4 = vcmask 261312  }
  0x11   :  { %7314 = vmatmul.mubr.msk.f32.gmra.mxu1 %vm46_vm0, %v139_v14  ;;  %v146_v21 = vld [vmem:[%s8824_s0 + $0x50] sm:$0xff]  ;;  %v147_v22 = vld [vmem:[%s8824_s0 + $0x58] sm:$0xff]  ;;  %v148_v23 = vld [vmem:[%s8824_s0 + $0x60] sm:$0xff]  ;;  %v7854_v48 = vshrl.u32 %v531_v46, 7  ;;  %vm823_vm5 = vcmask 326912   ;;  %vm830_vm6 = vcmask 392512  }
  0x12   :  { %7316 = vmatprep.mubr.msk.f32.mxu1 %vm46_vm0, %v140_v15  ;;  %v149_v24 = vld [vmem:[%s8824_s0 + $0x68] sm:$0xff]  ;;  %v150_v25 = vld [vmem:[%s8824_s0 + $0x70] sm:$0xff]  ;;  %v151_v26 = vld [vmem:[%s8824_s0 + $0x78] sm:$0xff]  ;;  %v530_v47 = vunpack.c.0.s8 %v529_v45  ;;  %vm837_vm7 = vcmask 458112   ;;  %vm844_vm8 = vcmask 523712   ;;  %vm851_vm9 = vcmask 589312  }
  0x13   :  { %v152_v27 = vld [vmem:[%s8824_s0 + $0x80] sm:$0xff]  ;;  %v153_v28 = vld [vmem:[%s8824_s0 + $0x88] sm:$0xff]  ;;  %v154_v29 = vld [vmem:[%s8824_s0 + $0x90] sm:$0xff]  ;;  %v552_v57 = vsub.s32 0, %v7854_v48  ;;  %vm858_vm10 = vcmask 654912   ;;  %vm865_vm11 = vcmask 720512  }
  0x14   :  { %v155_v30 = vld [vmem:[%s8824_s0 + $0x98] sm:$0xff]  ;;  %v156_v31 = vld [vmem:[%s8824_s0 + $0xa0] sm:$0xff]  ;;  %v157_v32 = vld [vmem:[%s8824_s0 + $0xa8] sm:$0xff]  ;;  %v533_v50 = vsub.s32 %v530_v47, %v7854_v48  ;;  %vm872_vm12 = vcmask 786112   ;;  %vm879_vm13 = vcmask 851712   ;;  %vm886_vm14 = vcmask 917312  }
  0x15   :  { %7317 = vmatmul.mubr.msk.f32.gmra.mxu1 %vm46_vm0, %v141_v16  ;;  %v158_v33 = vld [vmem:[%s8824_s0 + $0xb0] sm:$0xff]  ;;  %v159_v34 = vld [vmem:[%s8824_s0 + $0xb8] sm:$0xff]  ;;  %v160_v35 = vld [vmem:[%s8824_s0 + $0xc0] sm:$0xff]  ;;  %vm893_vm15 = vcmask 982912  }
  0x16   :  { %7319 = vmatprep.mubr.msk.f32.mxu1 %vm46_vm0, %v142_v17  ;;  %v161_v36 = vld [vmem:[%s8824_s0 + $0xc8] sm:$0xff]  ;;  %v162_v37 = vld [vmem:[%s8824_s0 + $0xd0] sm:$0xff]  ;;  %v163_v38 = vld [vmem:[%s8824_s0 + $0xd8] sm:$0xff] }
  0x17   :  { %v164_v39 = vld [vmem:[%s8824_s0 + $0xe0] sm:$0xff]  ;;  %v165_v40 = vld [vmem:[%s8824_s0 + $0xe8] sm:$0xff]  ;;  %v166_v41 = vld [vmem:[%s8824_s0 + $0xf0] sm:$0xff] }
  0x18   :  { %v167_v42 = vld [vmem:[%s8824_s0 + $0xf8] sm:$0xff]  ;;  %v134_v43 = vld [vmem:[#allocation3] sm:$0x1]  ;;  %v7168_v49 = vld [vmem:[%s8827_s3] ss:$0 sm:$0xff] }
  0x19   :  { %7320 = vmatmul.mubr.msk.f32.gmra.mxu1 %vm46_vm0, %v143_v18  ;;  %7445 = vpush %v134_v43  ;;  %v7864_v60 = vld [vmem:[%s8829_s5] ss:$0 sm:$0xff] }
  0x1a   :  { %7322 = vmatprep.mubr.msk.f32.mxu1 %vm46_vm0, %v144_v19 }
  0x1d   :  { %7323 = vmatmul.mubr.msk.f32.gmra.mxu1 %vm46_vm0, %v145_v20  ;;  %v7882_v20 = vld [vmem:[%s8830_s6] ss:$0 sm:$0xff] }
  0x1e   :  { %7325 = vmatprep.mubr.msk.f32.mxu1 %vm46_vm0, %v146_v21 }
  0x21   :  { %7326 = vmatmul.mubr.msk.f32.gmra.mxu1 %vm46_vm0, %v147_v22 }
  0x22   :  { %7328 = vmatprep.mubr.msk.f32.mxu1 %vm46_vm0, %v148_v23 }
  0x25   :  { %7329 = vmatmul.mubr.msk.f32.gmra.mxu1 %vm46_vm0, %v149_v24 }
  0x26   :  { %7331 = vmatprep.mubr.msk.f32.mxu1 %vm46_vm0, %v150_v25 }
  0x29   :  { %7332 = vmatmul.mubr.msk.f32.gmra.mxu1 %vm46_vm0, %v151_v26 }
  0x2a   :  { %7334 = vmatprep.mubr.msk.f32.mxu1 %vm46_vm0, %v152_v27 }
  0x2d   :  { %7335 = vmatmul.mubr.msk.f32.gmra.mxu1 %vm46_vm0, %v153_v28 }
  0x2e   :  { %7337 = vmatprep.mubr.msk.f32.mxu1 %vm46_vm0, %v154_v29 }
  0x31   :  { %7338 = vmatmul.mubr.msk.f32.gmra.mxu1 %vm46_vm0, %v155_v30 }
  0x32   :  { %7340 = vmatprep.mubr.msk.f32.mxu1 %vm46_vm0, %v156_v31 }
  0x35   :  { %7341 = vmatmul.mubr.msk.f32.gmra.mxu1 %vm46_vm0, %v157_v32 }
  0x36   :  { %7343 = vmatprep.mubr.msk.f32.mxu1 %vm46_vm0, %v158_v33 }
  0x39   :  { %7344 = vmatmul.mubr.msk.f32.gmra.mxu1 %vm46_vm0, %v159_v34 }
  0x3a   :  { %7346 = vmatprep.mubr.msk.f32.mxu1 %vm46_vm0, %v160_v35 }
  0x3d   :  { %7347 = vmatmul.mubr.msk.f32.gmra.mxu1 %vm46_vm0, %v161_v36 }
  0x3e   :  { %7349 = vmatprep.mubr.msk.f32.mxu1 %vm46_vm0, %v162_v37 }
  0x41   :  { %7350 = vmatmul.mubr.msk.f32.gmra.mxu1 %vm46_vm0, %v163_v38 }
  0x42   :  { %7352 = vmatprep.mubr.msk.f32.mxu1 %vm46_vm0, %v164_v39 }
  0x45   :  { %7353 = vmatmul.mubr.msk.f32.gmra.mxu1 %vm46_vm0, %v165_v40 }
  0x46   :  { %7355 = vmatprep.mubr.msk.f32.mxu1 %vm46_vm0, %v166_v41 }
  0x49   :  { %7356 = vmatmul.mubr.msk.f32.gmra.mxu1 %vm46_vm0, %v167_v42 }
  0x4a   :  { %7442 = vmatprep.mubr.msk.f32.mxu1 %vm7619_vm1, %v8836_v4  ;;  %s7446_s6 = spop %7445  ;;  %vm900_vm1 = vcmask 1048512  }
  0xcd   :  { %v116_v51 = vpop.f32.mrf.mxu0  ;;  %v7312_v52 = vpop.f32.mrf.mxu1 }
  0xce   :  { %v127_v53 = vadd.f32 %v7168_v49, %v116_v51  ;;  %v496_v0 = vadd.f32 %v7312_v52, %v7864_v60 }
  0xcf   :  { %v330_v54 = vpop.f32.mrf.mxu1  ;;  %v7301_v55 = vpop.f32.mrf.mxu0 }
  0xd0   :  { %v534_v56 = vrot.slane %v127_v53, %v533_v50  ;;  %v495_v63 = vadd.f32 %v7864_v60, %v330_v54 }
  0xd1   :  { %v7315_v58 = vpop.f32.mrf.mxu1 }
  0xd2   :  { %v542_v59 = vrot.slane %v534_v56, %v533_v50  ;;  %v498_v10 = vadd.f32 %v7315_v58, %v7864_v60  ;;  %v535_v19 = vcombine.high %v534_v56, %v534_v56 }
  0xd3   :  { %v340_v61 = vpop.f32.mrf.mxu1 }
  0xd4   :  { %v7866_v62 = vrot.slane %v542_v59, %v552_v57  ;;  %v497_v5 = vadd.f32 %v7864_v60, %v340_v61  ;;  %v549_v28 = vrot.slane %v535_v19, %v533_v50 }
  0xd5   :  { %v7318_v1 = vpop.f32.mrf.mxu1 }
  0xd6   :  { %v560_v2 = vadd.f32 %v7866_v62, %v495_v63  ;;  %v561_v3 = vadd.f32 %v7866_v62, %v496_v0  ;;  %v562_v8 = vadd.f32 %v7866_v62, %v497_v5  ;;  %v563_v12 = vadd.f32 %v7866_v62, %v498_v10 }
  0xd7   :  { %v350_v6 = vpop.f32.mrf.mxu1  ;;  %v500_v13 = vadd.f32 %v7318_v1, %v7864_v60  ;;  %v7898_v35 = vrot.slane %v549_v28, %v552_v57 }
  0xd8   :  { %7506 = vtanh.f32 %v560_v2  ;;  %v499_v17 = vadd.f32 %v7864_v60, %v350_v6 }
  0xd9   :  { %v7321_v7 = vpop.f32.mrf.mxu1  ;;  %7508 = vtanh.f32 %v561_v3  ;;  %v565_v16 = vadd.f32 %v7866_v62, %v500_v13 }
  0xda   :  { %7510 = vtanh.f32 %v562_v8  ;;  %v564_v23 = vadd.f32 %v7866_v62, %v499_v17  ;;  %v502_v24 = vadd.f32 %v7321_v7, %v7864_v60 }
  0xdb   :  { %v360_v9 = vpop.f32.mrf.mxu1  ;;  %7512 = vtanh.f32 %v563_v12 }
  0xdc   :  { %7514 = vtanh.f32 %v565_v16  ;;  %v567_v30 = vadd.f32 %v7866_v62, %v502_v24  ;;  %v501_v31 = vadd.f32 %v7864_v60, %v360_v9 }
  0xdd   :  { %v7324_v11 = vpop.f32.mrf.mxu1  ;;  %7516 = vtanh.f32 %v564_v23 }
  0xde   :  { %7518 = vtanh.f32 %v567_v30  ;;  %v566_v38 = vadd.f32 %v7866_v62, %v501_v31  ;;  %v504_v39 = vadd.f32 %v7324_v11, %v7864_v60 }
  0xdf   :  { %v370_v14 = vpop.f32.mrf.mxu1 }
  0xe0   :  { %v569_v50 = vadd.f32 %v7866_v62, %v504_v39  ;;  %v503_v51 = vadd.f32 %v7864_v60, %v370_v14 }
  0xe1   :  { %v7327_v15 = vpop.f32.mrf.mxu1 }
  0xe2   :  { %v568_v58 = vadd.f32 %v7866_v62, %v503_v51  ;;  %v506_v59 = vadd.f32 %v7327_v15, %v7864_v60 }
  0xe3   :  { %v380_v18 = vpop.f32.mrf.mxu1 }
  0xe4   :  { %v571_v5 = vadd.f32 %v7866_v62, %v506_v59  ;;  %v505_v6 = vadd.f32 %v7864_v60, %v380_v18 }
  0xe5   :  { %v7884_v21 = vpop.f32.mrf.mxu1  ;;  %v7507_v22 = vpop.eup %7506 }
  0xe6   :  { %v630_v26 = vmul.f32 %v7507_v22, %v7882_v20  ;;  %v7509_v27 = vpop.eup %7508  ;;  %v508_v12 = vadd.f32 %v7884_v21, %v7864_v60  ;;  %v570_v15 = vadd.f32 %v7866_v62, %v505_v6 }
  0xe7   :  { %v7888_v25 = vpop.f32.mrf.mxu1  ;;  %v631_v33 = vmul.f32 %v7509_v27, %v7882_v20  ;;  %v7511_v34 = vpop.eup %7510 }
  0xe8   :  { %662 = vadd.xlane.f32.xlu0 %v630_v26  ;;  %v632_v41 = vmul.f32 %v7511_v34, %v7882_v20  ;;  %v7513_v42 = vpop.eup %7512  ;;  %v573_v21 = vadd.f32 %v7866_v62, %v508_v12  ;;  %v507_v26 = vadd.f32 %v7864_v60, %v7888_v25 }
  0xe9   :  { %v7891_v29 = vpop.f32.mrf.mxu1  ;;  %v633_v53 = vmul.f32 %v7513_v42, %v7882_v20  ;;  %v7515_v54 = vpop.eup %7514 }
  0xea   :  { %v635_v63 = vmul.f32 %v7515_v54, %v7882_v20  ;;  %v7517_v0 = vpop.eup %7516 }
  0xeb   :  { %v7895_v32 = vpop.f32.mrf.mxu1  ;;  %v634_v8 = vmul.f32 %v7517_v0, %v7882_v20  ;;  %v7519_v9 = vpop.eup %7518 }
  0xec   :  { %664 = vadd.xlane.f32.xlu0 %v631_v33  ;;  %v637_v18 = vmul.f32 %v7519_v9, %v7882_v20 }
  0xed   :  { %v7336_v36 = vpop.f32.mrf.mxu1 }
  0xee   :  { %v512_v37 = vadd.f32 %v7336_v36, %v7864_v60 }
  0xef   :  { %v410_v40 = vpop.f32.mrf.mxu1 }
  0xf0   :  { %v577_v43 = vadd.f32 %v7898_v35, %v512_v37  ;;  %v511_v44 = vadd.f32 %v7864_v60, %v410_v40  ;;  %666 = vadd.xlane.f32.xlu0 %v632_v41  ;;  %v572_v40 = vadd.f32 %v7866_v62, %v507_v26  ;;  %v510_v41 = vadd.f32 %v7891_v29, %v7864_v60 }
  0xf1   :  { %v7339_v45 = vpop.f32.mrf.mxu1 }
  0xf2   :  { %7520 = vtanh.f32 %v577_v43  ;;  %v576_v47 = vadd.f32 %v7898_v35, %v511_v44  ;;  %v514_v49 = vadd.f32 %v7339_v45, %v7864_v60 }
  0xf3   :  { %7522 = vtanh.f32 %v566_v38  ;;  %v420_v52 = vpop.f32.mrf.mxu1 }
  0xf4   :  { %7524 = vtanh.f32 %v576_v47  ;;  %v579_v55 = vadd.f32 %v7898_v35, %v514_v49  ;;  %v513_v56 = vadd.f32 %v7864_v60, %v420_v52  ;;  %668 = vadd.xlane.f32.xlu0 %v633_v53 }
  0xf5   :  { %v7342_v57 = vpop.f32.mrf.mxu1  ;;  %7526 = vtanh.f32 %v569_v50 }
  0xf6   :  { %7528 = vtanh.f32 %v579_v55  ;;  %v578_v1 = vadd.f32 %v7898_v35, %v513_v56  ;;  %v516_v2 = vadd.f32 %v7342_v57, %v7864_v60  ;;  %v575_v55 = vadd.f32 %v7866_v62, %v510_v41 }
  0xf7   :  { %v430_v61 = vpop.f32.mrf.mxu1  ;;  %7530 = vtanh.f32 %v568_v58  ;;  %v509_v57 = vadd.f32 %v7864_v60, %v7895_v32 }
  0xf8   :  { %672 = vadd.xlane.f32.xlu0 %v635_v63  ;;  %7532 = vtanh.f32 %v578_v1  ;;  %v581_v10 = vadd.f32 %v7898_v35, %v516_v2  ;;  %v515_v11 = vadd.f32 %v7864_v60, %v430_v61 }
  0xf9   :  { %v7345_v3 = vpop.f32.mrf.mxu1  ;;  %7534 = vtanh.f32 %v571_v5 }
  0xfa   :  { %v518_v16 = vadd.f32 %v7345_v3, %v7864_v60  ;;  %7536 = vtanh.f32 %v581_v10  ;;  %v580_v22 = vadd.f32 %v7898_v35, %v515_v11 }
  0xfb   :  { %v440_v7 = vpop.f32.mrf.mxu1  ;;  %7538 = vtanh.f32 %v570_v15 }
  0xfc   :  { %670 = vadd.xlane.f32.xlu0 %v634_v8  ;;  %v583_v30 = vadd.f32 %v7898_v35, %v518_v16  ;;  %v517_v31 = vadd.f32 %v7864_v60, %v440_v7  ;;  %7540 = vtanh.f32 %v580_v22  ;;  %v574_v8 = vadd.f32 %v7866_v62, %v509_v57 }
  0xfd   :  { %v7348_v13 = vpop.f32.mrf.mxu1  ;;  %7542 = vtanh.f32 %v573_v21 }
  0xfe   :  { %v582_v45 = vadd.f32 %v7898_v35, %v517_v31  ;;  %v520_v47 = vadd.f32 %v7348_v13, %v7864_v60 }
  0xff   :  { %v7521_v14 = vpop.eup %7520  ;;  %v450_v17 = vpop.f32.mrf.mxu1 }
 0x100   :  { %v7523_v19 = vpop.eup %7522  ;;  %v647_v23 = vmul.f32 %v7521_v14, %v7882_v20  ;;  %676 = vadd.xlane.f32.xlu0 %v637_v18  ;;  %v585_v61 = vadd.f32 %v7898_v35, %v520_v47  ;;  %v519_v63 = vadd.f32 %v7864_v60, %v450_v17 }
 0x101   :  { %v7525_v24 = vpop.eup %7524  ;;  %v7351_v27 = vpop.f32.mrf.mxu1  ;;  %v636_v34 = vmul.f32 %v7523_v19, %v7882_v20 }
 0x102   :  { %v522_v28 = vadd.f32 %v7351_v27, %v7864_v60  ;;  %696 = vadd.xlane.f32.xlu1 %v647_v23  ;;  %v7527_v36 = vpop.eup %7526  ;;  %v646_v25 = vmul.f32 %v7525_v24, %v7882_v20  ;;  %v584_v11 = vadd.f32 %v7898_v35, %v519_v63 }
 0x103   :  { %v460_v33 = vpop.f32.mrf.mxu1  ;;  %v7529_v39 = vpop.eup %7528  ;;  %v639_v50 = vmul.f32 %v7527_v36, %v7882_v20 }
 0x104   :  { %v587_v37 = vadd.f32 %v7898_v35, %v522_v28  ;;  %v521_v38 = vadd.f32 %v7864_v60, %v460_v33  ;;  %674 = vadd.xlane.f32.xlu0 %v636_v34  ;;  %v7531_v51 = vpop.eup %7530  ;;  %v649_v53 = vmul.f32 %v7529_v39, %v7882_v20 }
 0x105   :  { %v7354_v42 = vpop.f32.mrf.mxu1  ;;  %v7533_v54 = vpop.eup %7532  ;;  %v638_v1 = vmul.f32 %v7531_v51, %v7882_v20 }
 0x106   :  { %7544 = vtanh.f32 %v587_v37  ;;  %v586_v43 = vadd.f32 %v7898_v35, %v521_v38  ;;  %v524_v44 = vadd.f32 %v7354_v42, %v7864_v60  ;;  %694 = vadd.xlane.f32.xlu1 %v646_v25  ;;  %v7535_v2 = vpop.eup %7534  ;;  %v648_v5 = vmul.f32 %v7533_v54, %v7882_v20 }
 0x107   :  { %7546 = vtanh.f32 %v583_v30  ;;  %v470_v49 = vpop.f32.mrf.mxu1  ;;  %v7537_v6 = vpop.eup %7536  ;;  %v641_v9 = vmul.f32 %v7535_v2, %v7882_v20 }
 0x108   :  { %7548 = vtanh.f32 %v586_v43  ;;  %v589_v29 = vadd.f32 %v7898_v35, %v524_v44  ;;  %v523_v52 = vadd.f32 %v7864_v60, %v470_v49  ;;  %680 = vadd.xlane.f32.xlu0 %v639_v50  ;;  %v7539_v10 = vpop.eup %7538 }
 0x109   :  { %7550 = vtanh.f32 %v572_v40  ;;  %v7357_v56 = vpop.f32.mrf.mxu1  ;;  %v7541_v12 = vpop.eup %7540  ;;  %v640_v15 = vmul.f32 %v7539_v10, %v7882_v20 }
 0x10a   :  { %7552 = vtanh.f32 %v589_v29  ;;  %v588_v58 = vadd.f32 %v7898_v35, %v523_v52  ;;  %v526_v59 = vadd.f32 %v7357_v56, %v7864_v60  ;;  %700 = vadd.xlane.f32.xlu1 %v649_v53  ;;  %v7543_v13 = vpop.eup %7542  ;;  %v650_v62 = vmul.f32 %v7541_v12, %v7882_v20 }
 0x10b   :  { %7554 = vtanh.f32 %v582_v45  ;;  %v480_v0 = vpop.f32.mrf.mxu1  ;;  %v643_v23 = vmul.f32 %v7543_v13, %v7882_v20 }
 0x10c   :  { %7556 = vtanh.f32 %v588_v58  ;;  %v591_v3 = vadd.f32 %v7898_v35, %v526_v59  ;;  %v525_v32 = vadd.f32 %v7864_v60, %v480_v0  ;;  %678 = vadd.xlane.f32.xlu0 %v638_v1  ;;  %v651_v60 = vmul.f32 %v7537_v6, %v7882_v20 }
 0x10d   :  { %7558 = vtanh.f32 %v575_v55  ;;  %v7996_v0 = vand.u32 127, %v531_v46 }
 0x10e   :  { %7560 = vtanh.f32 %v591_v3  ;;  %v590_v7 = vadd.f32 %v7898_v35, %v525_v32  ;;  %698 = vadd.xlane.f32.xlu1 %v648_v5 }
 0x10f   :  { %7562 = vtanh.f32 %v585_v61  ;;  %v797_v2 = vadd.s32 4294967288, %v7996_v0  ;;  %v804_v3 = vadd.s32 4294967280, %v7996_v0  ;;  %v811_v32 = vadd.s32 4294967272, %v7996_v0 }
 0x110   :  { %7564 = vtanh.f32 %v590_v7  ;;  %684 = vadd.xlane.f32.xlu0 %v641_v9  ;;  %v795_v6 = vsub.s32 %v7996_v0, %v7854_v48  ;;  %v825_v7 = vadd.s32 4294967256, %v7996_v0  ;;  %v8008_v9 = vstv %s7446_s6 }
 0x111   :  { %7566 = vtanh.f32 %v574_v8  ;;  %v800_v46 = vsub.s32 %v797_v2, %v7854_v48  ;;  %v818_v10 = vadd.s32 4294967264, %v7996_v0  ;;  %v814_v13 = vsub.s32 %v811_v32, %v7854_v48 }
 0x112   :  { %704 = vadd.xlane.f32.xlu1 %v651_v60  ;;  %7568 = vtanh.f32 %v584_v11  ;;  %v807_v11 = vsub.s32 %v804_v3, %v7854_v48  ;;  %v839_v60 = vadd.s32 4294967240, %v7996_v0 }
 0x113   :  { %v7545_v14 = vpop.eup %7544 }
 0x114   :  { %v7547_v16 = vpop.eup %7546  ;;  %v657_v17 = vmul.f32 %v7545_v14, %v7882_v20  ;;  %682 = vadd.xlane.f32.xlu0 %v640_v15  ;;  %v832_v14 = vadd.s32 4294967248, %v7996_v0 }
 0x115   :  { %v7549_v18 = vpop.eup %7548  ;;  %v653_v21 = vmul.f32 %v7547_v16, %v7882_v20 }
 0x116   :  { %v7551_v35 = vpop.eup %7550  ;;  %702 = vadd.xlane.f32.xlu1 %v650_v62  ;;  %v656_v19 = vmul.f32 %v7549_v18, %v7882_v20  ;;  %v8020_v62 = vsub.s32 %v825_v7, %v7854_v48 }
 0x117   :  { %v7553_v22 = vpop.eup %7552  ;;  %v642_v33 = vmul.f32 %v7551_v35, %v7882_v20 }
 0x118   :  { %v7555_v24 = vpop.eup %7554  ;;  %v659_v26 = vmul.f32 %v7553_v22, %v7882_v20  ;;  %688 = vadd.xlane.f32.xlu0 %v643_v23  ;;  %v821_v22 = vsub.s32 %v818_v10, %v7854_v48 }
 0x119   :  { %v7557_v27 = vpop.eup %7556  ;;  %v652_v36 = vmul.f32 %v7555_v24, %v7882_v20 }
 0x11a   :  { %v7559_v28 = vpop.eup %7558  ;;  %708 = vadd.xlane.f32.xlu1 %v653_v21  ;;  %v658_v30 = vmul.f32 %v7557_v27, %v7882_v20  ;;  %v853_v27 = vadd.s32 4294967224, %v7996_v0 }
 0x11b   :  { %v7561_v31 = vpop.eup %7560  ;;  %v645_v39 = vmul.f32 %v7559_v28, %v7882_v20 }
 0x11c   :  { %v7563_v34 = vpop.eup %7562  ;;  %v661_v37 = vmul.f32 %v7561_v31, %v7882_v20  ;;  %686 = vadd.xlane.f32.xlu0 %v642_v33 }
 0x11d   :  { %v7565_v38 = vpop.eup %7564  ;;  %v655_v41 = vmul.f32 %v7563_v34, %v7882_v20  ;;  %v846_v34 = vadd.s32 4294967232, %v7996_v0 }
 0x11e   :  { %706 = vadd.xlane.f32.xlu1 %v652_v36  ;;  %v660_v25 = vmul.f32 %v7565_v38, %v7882_v20  ;;  %v7567_v40 = vpop.eup %7566 }
 0x11f   :  { %v7569_v42 = vpop.eup %7568  ;;  %v644_v43 = vmul.f32 %v7567_v40, %v7882_v20  ;;  %v849_v3 = vsub.s32 %v846_v34, %v7854_v48 }
 0x120   :  { %692 = vadd.xlane.f32.xlu0 %v645_v39  ;;  %v654_v44 = vmul.f32 %v7569_v42, %v7882_v20 }
 0x122   :  { %712 = vadd.xlane.f32.xlu1 %v655_v41 }
 0x124   :  { %690 = vadd.xlane.f32.xlu0 %v644_v43 }
 0x126   :  { %710 = vadd.xlane.f32.xlu1 %v654_v44  ;;  %v8042_v44 = vsub.s32 %v853_v27, %v7854_v48 }
 0x12a   :  { %716 = vadd.xlane.f32.xlu1 %v657_v17 }
 0x12e   :  { %714 = vadd.xlane.f32.xlu1 %v656_v19 }
 0x132   :  { %720 = vadd.xlane.f32.xlu1 %v659_v26  ;;  %v8033_v26 = vsub.s32 %v839_v60, %v7854_v48 }
 0x136   :  { %718 = vadd.xlane.f32.xlu1 %v658_v30  ;;  %v835_v30 = vsub.s32 %v832_v14, %v7854_v48 }
 0x13a   :  { %722 = vadd.xlane.f32.xlu1 %v660_v25 }
 0x13e   :  { %724 = vadd.xlane.f32.xlu1 %v661_v37 }
 0x171   :  { %v663_v45 = vpop.xlane.xlu0 %662 }
 0x172   :  { %v727_v35 = vadd.f32 %v8008_v9, %v663_v45 }
 0x174   :  { %v796_v25 = vrot.slane %v727_v35, %v795_v6 }
 0x175   :  { %v665_v47 = vpop.xlane.xlu0 %664 }
 0x176   :  { %v728_v12 = vadd.f32 %v8008_v9, %v665_v47 }
 0x178   :  { %v801_v28 = vrot.slane %v728_v12, %v800_v46 }
 0x179   :  { %v667_v49 = vpop.xlane.xlu0 %666 }
 0x17a   :  { %v729_v16 = vadd.f32 %v8008_v9, %v667_v49  ;;  %v803_v45 = vsel %vm802_vm2, %v801_v28, %v796_v25 }
 0x17c   :  { %v808_v33 = vrot.slane %v729_v16, %v807_v11 }
 0x17d   :  { %v669_v50 = vpop.xlane.xlu0 %668 }
 0x17e   :  { %v730_v19 = vadd.f32 %v8008_v9, %v669_v50  ;;  %v867_v50 = vadd.s32 4294967208, %v7996_v0 }
 0x180   :  { %v815_v39 = vrot.slane %v730_v19, %v814_v13 }
 0x181   :  { %v7983_v51 = vpop.xlane.xlu0 %672 }
 0x182   :  { %v732_v47 = vadd.f32 %v8008_v9, %v7983_v51 }
 0x184   :  { %v829_v10 = vrot.slane %v732_v47, %v8020_v62 }
 0x185   :  { %v671_v29 = vpop.xlane.xlu0 %670 }
 0x186   :  { %v731_v21 = vadd.f32 %v8008_v9, %v671_v29 }
 0x188   :  { %v822_v42 = vrot.slane %v731_v21, %v821_v22 }
 0x189   :  { %v7985_v52 = vpop.xlane.xlu0 %676 }
 0x18b   :  { %v697_v53 = vpop.xlane.xlu1 %696 }
 0x18c   :  { %v744_v23 = vadd.f32 %v8008_v9, %v697_v53  ;;  %v810_v53 = vsel %vm809_vm3, %v808_v33, %v803_v45 }
 0x18d   :  { %v675_v54 = vpop.xlane.xlu0 %674 }
 0x18e   :  { %v909_v40 = vrot.slane %v744_v23, %v800_v46  ;;  %v733_v43 = vadd.f32 %v8008_v9, %v675_v54  ;;  %v860_v46 = vadd.s32 4294967216, %v7996_v0 }
 0x18f   :  { %v695_v20 = vpop.xlane.xlu1 %694 }
 0x190   :  { %v743_v15 = vadd.f32 %v8008_v9, %v695_v20 }
 0x191   :  { %v7987_v56 = vpop.xlane.xlu0 %680 }
 0x192   :  { %v905_v31 = vrot.slane %v743_v15, %v795_v6  ;;  %v836_v6 = vrot.slane %v733_v43, %v835_v30  ;;  %v736_v27 = vadd.f32 %v8008_v9, %v7987_v56 }
 0x193   :  { %v701_v55 = vpop.xlane.xlu1 %700 }
 0x194   :  { %v746_v41 = vadd.f32 %v8008_v9, %v701_v55  ;;  %v910_v49 = vsel %vm802_vm2, %v909_v40, %v905_v31  ;;  %v857_v40 = vrot.slane %v736_v27, %v8042_v44  ;;  %vm981_vm2 = vcmask 1041409  }
 0x195   :  { %v7989_v58 = vpop.xlane.xlu0 %678 }
 0x196   :  { %v919_v2 = vrot.slane %v746_v41, %v814_v13  ;;  %v735_v7 = vadd.f32 %v8008_v9, %v7989_v58 }
 0x197   :  { %v699_v57 = vpop.xlane.xlu1 %698 }
 0x198   :  { %v745_v17 = vadd.f32 %v8008_v9, %v699_v57  ;;  %v850_v19 = vrot.slane %v735_v7, %v849_v3 }
 0x199   :  { %v7993_v63 = vpop.xlane.xlu0 %684 }
 0x19a   :  { %v914_v36 = vrot.slane %v745_v17, %v807_v11  ;;  %v8064_v11 = vsub.s32 %v867_v50, %v7854_v48  ;;  %v738_v41 = vadd.f32 %v8008_v9, %v7993_v63 }
 0x19b   :  { %v7991_v59 = vpop.xlane.xlu1 %704 }
 0x19c   :  { %v915_v20 = vsel %vm809_vm3, %v914_v36, %v910_v49  ;;  %v748_v51 = vadd.f32 %v8008_v9, %v7991_v59  ;;  %vm986_vm3 = vcmp.lt.s32.totalorder %v7996_v0, 8 }
 0x19d   :  { %v8003_v5 = vpop.xlane.xlu0 %682  ;;  %v920_v60 = vsel %vm816_vm4, %v919_v2, %v915_v20  ;;  %v871_v2 = vrot.slane %v738_v41, %v8064_v11 }
 0x19e   :  { %v929_v15 = vrot.slane %v748_v51, %v8020_v62  ;;  %v737_v23 = vadd.f32 %v8008_v9, %v8003_v5  ;;  %v881_v62 = vadd.s32 4294967192, %v7996_v0 }
 0x19f   :  { %v703_v61 = vpop.xlane.xlu1 %702 }
 0x1a0   :  { %v747_v37 = vadd.f32 %v8008_v9, %v703_v61  ;;  %v817_v61 = vsel %vm816_vm4, %v815_v39, %v810_v53  ;;  %v888_v39 = vadd.s32 4294967184, %v7996_v0  ;;  %vm990_vm4 = vcmask 1041408  }
 0x1a1   :  { %v8029_v24 = vpop.xlane.xlu0 %688  ;;  %v824_v32 = vsel %vm823_vm5, %v822_v42, %v817_v61  ;;  %v884_v42 = vsub.s32 %v881_v62, %v7854_v48 }
 0x1a2   :  { %v924_v54 = vrot.slane %v747_v37, %v821_v22  ;;  %v831_v58 = vsel %vm830_vm6, %v829_v10, %v824_v32  ;;  %v863_v22 = vsub.s32 %v860_v46, %v7854_v48 }
 0x1a3   :  { %v7998_v1 = vpop.xlane.xlu1 %708  ;;  %v838_v35 = vsel %vm837_vm7, %v836_v6, %v831_v58 }
 0x1a4   :  { %v925_v59 = vsel %vm823_vm5, %v924_v54, %v920_v60  ;;  %v750_v16 = vadd.f32 %v8008_v9, %v7998_v1 }
 0x1a5   :  { %v687_v29 = vpop.xlane.xlu0 %686  ;;  %v930_v1 = vsel %vm830_vm6, %v929_v15, %v925_v59 }
 0x1a6   :  { %v939_v5 = vrot.slane %v750_v16, %v8033_v26  ;;  %v739_v25 = vadd.f32 %v8008_v9, %v687_v29 }
 0x1a7   :  { %v707_v8 = vpop.xlane.xlu1 %706 }
 0x1a8   :  { %v749_v55 = vadd.f32 %v8008_v9, %v707_v8  ;;  %v734_v8 = vadd.f32 %v8008_v9, %v7985_v52  ;;  %v874_v52 = vadd.s32 4294967200, %v7996_v0 }
 0x1a9   :  { %v693_v17 = vpop.xlane.xlu0 %692 }
 0x1aa   :  { %v934_v12 = vrot.slane %v749_v55, %v835_v30  ;;  %v843_v21 = vrot.slane %v734_v8, %v8033_v26  ;;  %v877_v36 = vsub.s32 %v874_v52, %v7854_v48  ;;  %v891_v55 = vsub.s32 %v888_v39, %v7854_v48 }
 0x1ab   :  { %v8023_v18 = vpop.xlane.xlu1 %712 }
 0x1ac   :  { %v935_v28 = vsel %vm837_vm7, %v934_v12, %v930_v1  ;;  %v845_v34 = vsel %vm844_vm8, %v843_v21, %v838_v35  ;;  %v752_v56 = vadd.f32 %v8008_v9, %v8023_v18  ;;  %v895_v18 = vadd.s32 4294967176, %v7996_v0 }
 0x1ad   :  { %v852_v37 = vsel %vm851_vm9, %v850_v19, %v845_v34  ;;  %v691_v26 = vpop.xlane.xlu0 %690  ;;  %v940_v43 = vsel %vm844_vm8, %v939_v5, %v935_v28  ;;  %v878_v54 = vrot.slane %v739_v25, %v877_v36  ;;  %v742_v12 = vadd.f32 %v8008_v9, %v693_v17 }
 0x1ae   :  { %v859_v50 = vsel %vm858_vm10, %v857_v40, %v852_v37  ;;  %v949_v29 = vrot.slane %v752_v56, %v8042_v44  ;;  %v741_v61 = vadd.f32 %v8008_v9, %v691_v26  ;;  %v898_v60 = vsub.s32 %v895_v18, %v7854_v48 }
 0x1af   :  { %v711_v38 = vpop.xlane.xlu1 %710  ;;  %v7622_v25 = vmov 1934713408  }
 0x1b0   :  { %v751_v13 = vadd.f32 %v8008_v9, %v711_v38  ;;  %v864_v38 = vrot.slane %v737_v23, %v863_v22  ;;  %v899_v19 = vrot.slane %v742_v12, %v898_v60  ;;  %v1084_v39 = vunpack.c.l.s4 %v7622_v25 }
 0x1b2   :  { %v944_v30 = vrot.slane %v751_v13, %v849_v3  ;;  %v866_v20 = vsel %vm865_vm11, %v864_v38, %v859_v50  ;;  %v740_v3 = vadd.f32 %v8008_v9, %v8029_v24  ;;  %v892_v24 = vrot.slane %v741_v61, %v891_v55 }
 0x1b3   :  { %v717_v57 = vpop.xlane.xlu1 %716  ;;  %v873_v6 = vsel %vm872_vm12, %v871_v2, %v866_v20  ;;  %v7621_v38 = vmov 1983009808  }
 0x1b4   :  { %v945_v45 = vsel %vm851_vm9, %v944_v30, %v940_v43  ;;  %v754_v53 = vadd.f32 %v8008_v9, %v717_v57  ;;  %v880_v8 = vsel %vm879_vm13, %v878_v54, %v873_v6  ;;  %v885_v59 = vrot.slane %v740_v3, %v884_v42 }
 0x1b5   :  { %v950_v51 = vsel %vm858_vm10, %v949_v29, %v945_v45  ;;  %v1069_v0 = vunpack.c.l.s4 %v7621_v38 }
 0x1b6   :  { %v959_v7 = vrot.slane %v754_v53, %v8064_v11  ;;  %v887_v15 = vsel %vm886_vm14, %v885_v59, %v880_v8 }
 0x1b7   :  { %v715_v14 = vpop.xlane.xlu1 %714  ;;  %v894_v35 = vsel %vm893_vm15, %v892_v24, %v887_v15  ;;  %v1070_v40 = vunpack.c.0.s8 %v1069_v0 }
 0x1b8   :  { %v753_v31 = vadd.f32 %v8008_v9, %v715_v14  ;;  %v901_v27 = vsel %vm900_vm1, %v899_v19, %v894_v35 }
 0x1b9   :  { %v8126_v26 = vsub.s32 %v1070_v40, %v7854_v48 }
 0x1ba   :  { %v954_v47 = vrot.slane %v753_v31, %v863_v22 }
 0x1bb   :  { %v721_v33 = vpop.xlane.xlu1 %720 }
 0x1bc   :  { %v955_v44 = vsel %vm865_vm11, %v954_v47, %v950_v51  ;;  %v756_v46 = vadd.f32 %v8008_v9, %v721_v33 }
 0x1bd   :  { %v960_v13 = vsel %vm872_vm12, %v959_v7, %v955_v44 }
 0x1be   :  { %v969_v16 = vrot.slane %v756_v46, %v884_v42  ;;  %v1085_v42 = vunpack.c.0.s8 %v1084_v39 }
 0x1bf   :  { %v719_v49 = vpop.xlane.xlu1 %718 }
 0x1c0   :  { %v755_v63 = vadd.f32 %v8008_v9, %v719_v49  ;;  %v8131_v18 = vsub.s32 %v1085_v42, %v7854_v48 }
 0x1c2   :  { %v964_v57 = vrot.slane %v755_v63, %v877_v36 }
 0x1c3   :  { %v723_v32 = vpop.xlane.xlu1 %722 }
 0x1c4   :  { %v757_v10 = vadd.f32 %v8008_v9, %v723_v32  ;;  %v965_v14 = vsel %vm879_vm13, %v964_v57, %v960_v13 }
 0x1c5   :  { %v970_v22 = vsel %vm886_vm14, %v969_v16, %v965_v14 }
 0x1c6   :  { %v974_v58 = vrot.slane %v757_v10, %v891_v55 }
 0x1c7   :  { %v725_v11 = vpop.xlane.xlu1 %724 }
 0x1c8   :  { %v758_v52 = vadd.f32 %v8008_v9, %v725_v11  ;;  %v975_v21 = vsel %vm893_vm15, %v974_v58, %v970_v22 }
 0x1ca   :  { %v979_v23 = vrot.slane %v758_v52, %v898_v60 }
 0x1cc   :  { %v980_v17 = vsel %vm900_vm1, %v979_v23, %v975_v21 }
 0x1cd   :  { %v982_v62 = vsel %vm981_vm2, %v980_v17, %v901_v27 }
 0x1ce   :  { %984 = vst [vmem:[#allocation2] sm:$0x3] %v982_v62 }
 0x1d5   :  { %v985_v1 = vld [vmem:[#allocation2] sm:$0x3] }
 0x1d6   :  { %v989_v28 = vsel %vm986_vm3, %v985_v1, -inf }
 0x1d7   :  { %v991_v30 = vsel %vm990_vm4, %v989_v28, -inf }
 0x1d8   :  { %992 = vmax.xlane.f32.xlu0 %v991_v30 }
 0x261   :  { %v993_v31 = vpop.xlane.xlu0 %992 }
 0x262   :  { %v994_v9 = vsub.f32 %v989_v28, %v993_v31 }
 0x264   :  { %v995_v33 = vmul.f32 1.442695, %v994_v9 }
 0x266   :  { %7570 = vpow2.f32 %v995_v33 }
 0x273   :  { %v7571_v34 = vpop.eup %7570 }
 0x274   :  { %v997_v5 = vsel %vm990_vm4, %v7571_v34, 0.0 }
 0x275   :  { %998 = vadd.xlane.f32.xlu1 %v997_v5 }
 0x2fe   :  { %v999_v36 = vpop.xlane.xlu1 %998 }
 0x2ff   :  { %7572 = vrcp.f32 %v999_v36 }
 0x30c   :  { %v7573_v56 = vpop.eup %7572 }
 0x30d   :  { %v1001_v37 = vmul.f32 %v7573_v56, %v7571_v34 }
 0x30f   :  { %1035 = vxpose.xlu0.b32.start.end [1/1] (short) %v1001_v37, 128  ;;  %1002 = vst [vmem:[#allocation6] sm:$0x3] %v1001_v37 }
 0x38b   :  { %v8123_v41 = vpop.trf.xlu0 }
 0x38f   :  { %v8128_v43 = vpop.trf.xlu0 }
 0x390   :  { %v8135_v45 = vrot.slane %v8128_v43, %v8126_v26 }
 0x392   :  { %v8139_v47 = vrot.slane %v8135_v45, %v8131_v18 }
 0x393   :  { %v1053_v49 = vpop.trf.xlu0 }
 0x394   :  { %v1165_v50 = vcombine.high %v1053_v49, %v8836_v4  ;;  %2107 = vxpose.xlu0.b32.start.end [1/1] (short) (narrow) %v8139_v47, 8  ;;  %v1172_v29 = vrot.slane %v1053_v49, %v8126_v26 }
 0x396   :  { %v1187_v53 = vrot.slane %v1172_v29, %v8131_v18  ;;  %v1180_v48 = vcombine.high %v1172_v29, %v8836_v4  ;;  %v1179_v55 = vrot.slane %v1165_v50, %v8126_v26 }
 0x397   :  { %v1054_v63 = vpop.trf.xlu0 }
 0x398   :  { %2363 = vxpose.xlu0.b32.start.end [1/1] (short) (narrow) %v1187_v53, 8  ;;  %v1210_v20 = vcombine.high %v1187_v53, %v8836_v4  ;;  %v1194_v54 = vrot.slane %v1180_v48, %v8131_v18  ;;  %v1221_v61 = vrot.slane %v1054_v63, %v8126_v26  ;;  %v1202_v3 = vrot.slane %v1179_v55, %v8131_v18 }
 0x399   :  { %v1195_v57 = vcombine.high %v1179_v55, %v8836_v4  ;;  %v1214_v6 = vcombine.high %v1054_v63, %v8836_v4 }
 0x39a   :  { %2395 = vxpose.xlu1.b32.start.end [1/1] (short) (narrow) %v1210_v20, 8  ;;  %v1211_v2 = vcombine.high %v1194_v54, %v8836_v4  ;;  %v1236_v51 = vrot.slane %v1221_v61, %v8131_v18  ;;  %v1212_v44 = vcombine.high %v1202_v3, %v8836_v4  ;;  %v1229_v46 = vcombine.high %v1221_v61, %v8836_v4 }
 0x39b   :  { %v1209_v7 = vrot.slane %v1195_v57, %v8131_v18  ;;  %v1055_v10 = vpop.trf.xlu0  ;;  %v1228_v24 = vrot.slane %v1214_v6, %v8126_v26 }
 0x39c   :  { %2427 = vxpose.xlu0.b32.start.end [1/1] (short) (narrow) %v1194_v54, 8  ;;  %v1259_v32 = vcombine.high %v1236_v51, %v8836_v4  ;;  %v1243_v60 = vrot.slane %v1229_v46, %v8131_v18  ;;  %v1270_v59 = vrot.slane %v1055_v10, %v8126_v26  ;;  %v1263_v16 = vcombine.high %v1055_v10, %v8836_v4 }
 0x39d   :  { %v1213_v8 = vcombine.high %v1209_v7, %v8836_v4  ;;  %v1251_v13 = vrot.slane %v1228_v24, %v8131_v18  ;;  %v1244_v11 = vcombine.high %v1228_v24, %v8836_v4 }
 0x39e   :  { %2459 = vxpose.xlu1.b32.start.end [1/1] (short) (narrow) %v1211_v2, 8  ;;  %v1260_v12 = vcombine.high %v1243_v60, %v8836_v4  ;;  %v1285_v14 = vrot.slane %v1270_v59, %v8131_v18  ;;  %v1278_v35 = vcombine.high %v1270_v59, %v8836_v4  ;;  %v1277_v21 = vrot.slane %v1263_v16, %v8126_v26 }
 0x39f   :  { %v1261_v58 = vcombine.high %v1251_v13, %v8836_v4  ;;  %v1258_v52 = vrot.slane %v1244_v11, %v8131_v18  ;;  %v1056_v19 = vpop.trf.xlu0 }
 0x3a0   :  { %2491 = vxpose.xlu0.b32.start.end [1/1] (short) (narrow) %v1202_v3, 8  ;;  %v1308_v15 = vcombine.high %v1285_v14, %v8836_v4  ;;  %v1292_v23 = vrot.slane %v1278_v35, %v8131_v18  ;;  %v1319_v27 = vrot.slane %v1056_v19, %v8126_v26  ;;  %v1300_v62 = vrot.slane %v1277_v21, %v8131_v18 }
 0x3a1   :  { %v1262_v22 = vcombine.high %v1258_v52, %v8836_v4  ;;  %v1293_v30 = vcombine.high %v1277_v21, %v8836_v4  ;;  %v1312_v9 = vcombine.high %v1056_v19, %v8836_v4 }
 0x3a2   :  { %2523 = vxpose.xlu1.b32.start.end [1/1] (short) (narrow) %v1212_v44, 8  ;;  %v1309_v17 = vcombine.high %v1292_v23, %v8836_v4  ;;  %v1334_v1 = vrot.slane %v1319_v27, %v8131_v18  ;;  %v1310_v28 = vcombine.high %v1300_v62, %v8836_v4  ;;  %v1327_v34 = vcombine.high %v1319_v27, %v8836_v4 }
 0x3a3   :  { %v1307_v33 = vrot.slane %v1293_v30, %v8131_v18  ;;  %v1057_v5 = vpop.trf.xlu0  ;;  %v1326_v37 = vrot.slane %v1312_v9, %v8126_v26 }
 0x3a4   :  { %2619 = vxpose.xlu0.b32.start.end [1/1] (short) (narrow) %v1236_v51, 8  ;;  %v1357_v31 = vcombine.high %v1334_v1, %v8836_v4  ;;  %v1341_v56 = vrot.slane %v1327_v34, %v8131_v18  ;;  %v1368_v38 = vrot.slane %v1057_v5, %v8126_v26  ;;  %v1361_v50 = vcombine.high %v1057_v5, %v8836_v4 }
 0x3a5   :  { %v1311_v36 = vcombine.high %v1307_v33, %v8836_v4  ;;  %v1349_v25 = vrot.slane %v1326_v37, %v8131_v18  ;;  %v1342_v40 = vcombine.high %v1326_v37, %v8836_v4 }
 0x3a6   :  { %2651 = vxpose.xlu1.b32.start.end [1/1] (short) (narrow) %v1259_v32, 8  ;;  %v1358_v0 = vcombine.high %v1341_v56, %v8836_v4  ;;  %v1383_v39 = vrot.slane %v1368_v38, %v8131_v18  ;;  %v1376_v29 = vcombine.high %v1368_v38, %v8836_v4  ;;  %v1375_v63 = vrot.slane %v1361_v50, %v8126_v26 }
 0x3a7   :  { %v1359_v42 = vcombine.high %v1349_v25, %v8836_v4  ;;  %v1356_v53 = vrot.slane %v1342_v40, %v8131_v18  ;;  %v1058_v48 = vpop.trf.xlu0 }
 0x3a8   :  { %2555 = vxpose.xlu0.b32.start.end [1/1] (short) (narrow) %v1209_v7, 8  ;;  %v1406_v49 = vcombine.high %v1383_v39, %v8836_v4  ;;  %v1390_v54 = vrot.slane %v1376_v29, %v8131_v18  ;;  %v1417_v55 = vrot.slane %v1058_v48, %v8126_v26  ;;  %v1398_v2 = vrot.slane %v1375_v63, %v8131_v18 }
 0x3a9   :  { %v1360_v20 = vcombine.high %v1356_v53, %v8836_v4  ;;  %v1391_v44 = vcombine.high %v1375_v63, %v8836_v4  ;;  %v1410_v6 = vcombine.high %v1058_v48, %v8836_v4 }
 0x3aa   :  { %2587 = vxpose.xlu1.b32.start.end [1/1] (short) (narrow) %v1213_v8, 8  ;;  %v1407_v61 = vcombine.high %v1390_v54, %v8836_v4  ;;  %v1432_v3 = vrot.slane %v1417_v55, %v8131_v18  ;;  %v1408_v51 = vcombine.high %v1398_v2, %v8836_v4  ;;  %v1425_v7 = vcombine.high %v1417_v55, %v8836_v4 }
 0x3ab   :  { %v1059_v57 = vpop.trf.xlu0  ;;  %v1405_v46 = vrot.slane %v1391_v44, %v8131_v18  ;;  %v1424_v8 = vrot.slane %v1410_v6, %v8126_v26 }
 0x3ac   :  { %2683 = vxpose.xlu0.b32.start.end [1/1] (short) (narrow) %v1243_v60, 8  ;;  %v1455_v32 = vcombine.high %v1432_v3, %v8836_v4  ;;  %v1439_v24 = vrot.slane %v1425_v7, %v8131_v18  ;;  %v1466_v59 = vrot.slane %v1059_v57, %v8126_v26  ;;  %v1459_v35 = vcombine.high %v1059_v57, %v8836_v4 }
 0x3ad   :  { %v1409_v60 = vcombine.high %v1405_v46, %v8836_v4 }
 0x3ae   :  { %2715 = vxpose.xlu1.b32.start.end [1/1] (short) (narrow) %v1260_v12, 8  ;;  %v1456_v12 = vcombine.high %v1439_v24, %v8836_v4  ;;  %v1474_v19 = vcombine.high %v1466_v59, %v8836_v4 }
 0x3af   :  { %v1060_v10 = vpop.trf.xlu0 }
 0x3b0   :  { %2747 = vxpose.xlu0.b32.start.end [1/1] (short) (narrow) %v1251_v13, 8  ;;  %v1447_v13 = vrot.slane %v1424_v8, %v8131_v18  ;;  %v1488_v27 = vrot.slane %v1474_v19, %v8131_v18  ;;  %v1508_v5 = vcombine.high %v1060_v10, %v8836_v4 }
 0x3b2   :  { %2779 = vxpose.xlu1.b32.start.end [1/1] (short) (narrow) %v1261_v58, 8  ;;  %v1481_v58 = vrot.slane %v1466_v59, %v8131_v18  ;;  %v1457_v11 = vcombine.high %v1447_v13, %v8836_v4  ;;  %v1522_v38 = vrot.slane %v1508_v5, %v8126_v26 }
 0x3b4   :  { %2875 = vxpose.xlu0.b32.start.end [1/1] (short) (narrow) %v1285_v14, 8  ;;  %v1061_v14 = vpop.trf.xlu0  ;;  %v1504_v16 = vcombine.high %v1481_v58, %v8836_v4  ;;  %v1538_v48 = vcombine.high %v1522_v38, %v8836_v4 }
 0x3b6   :  { %2907 = vxpose.xlu1.b32.start.end [1/1] (short) (narrow) %v1308_v15, 8  ;;  %v1440_v15 = vcombine.high %v1424_v8, %v8836_v4 }
 0x3b8   :  { %2811 = vxpose.xlu0.b32.start.end [1/1] (short) (narrow) %v1258_v52, 8  ;;  %v8221_v52 = vpop.trf.xlu0 }
 0x3ba   :  { %2843 = vxpose.xlu1.b32.start.end [1/1] (short) (narrow) %v1262_v22, 8  ;;  %v1454_v22 = vrot.slane %v1440_v15, %v8131_v18 }
 0x3bc   :  { %2939 = vxpose.xlu0.b32.start.end [1/1] (short) (narrow) %v1292_v23, 8  ;;  %v1473_v23 = vrot.slane %v1459_v35, %v8126_v26  ;;  %v1458_v21 = vcombine.high %v1454_v22, %v8836_v4 }
 0x3be   :  { %2971 = vxpose.xlu1.b32.start.end [1/1] (short) (narrow) %v1309_v17, 8  ;;  %v8229_v17 = vpop.trf.xlu0 }
 0x3c0   :  { %3003 = vxpose.xlu0.b32.start.end [1/1] (short) (narrow) %v1300_v62, 8  ;;  %v1515_v62 = vrot.slane %v1060_v10, %v8126_v26 }
 0x3c2   :  { %3035 = vxpose.xlu1.b32.start.end [1/1] (short) (narrow) %v1310_v28, 8  ;;  %v1496_v28 = vrot.slane %v1473_v23, %v8131_v18  ;;  %v1530_v30 = vrot.slane %v1515_v62, %v8131_v18 }
 0x3c4   :  { %3131 = vxpose.xlu0.b32.start.end [1/1] (short) (narrow) %v1334_v1, 8  ;;  %v1505_v1 = vcombine.high %v1488_v27, %v8836_v4  ;;  %v1506_v9 = vcombine.high %v1496_v28, %v8836_v4  ;;  %v1553_v34 = vcombine.high %v1530_v30, %v8836_v4 }
 0x3c6   :  { %3163 = vxpose.xlu1.b32.start.end [1/1] (short) (narrow) %v1357_v31, 8  ;;  %v8235_v31 = vpop.trf.xlu0 }
 0x3c8   :  { %3067 = vxpose.xlu0.b32.start.end [1/1] (short) (narrow) %v1307_v33, 8  ;;  %v1489_v33 = vcombine.high %v1473_v23, %v8836_v4 }
 0x3ca   :  { %3099 = vxpose.xlu1.b32.start.end [1/1] (short) (narrow) %v1311_v36, 8  ;;  %v1523_v36 = vcombine.high %v1515_v62, %v8836_v4  ;;  %v8243_v37 = vpop.trf.xlu0 }
 0x3cc   :  { %3195 = vxpose.xlu0.b32.start.end [1/1] (short) (narrow) %v1341_v56, 8  ;;  %v1503_v56 = vrot.slane %v1489_v33, %v8131_v18 }
 0x3ce   :  { %3227 = vxpose.xlu1.b32.start.end [1/1] (short) (narrow) %v1358_v0, 8  ;;  %v1507_v0 = vcombine.high %v1503_v56, %v8836_v4  ;;  %v8249_v40 = vpop.trf.xlu0 }
 0x3d0   :  { %3259 = vxpose.xlu0.b32.start.end [1/1] (short) (narrow) %v1349_v25, 8  ;;  %v1537_v25 = vrot.slane %v1523_v36, %v8131_v18 }
 0x3d2   :  { %3291 = vxpose.xlu1.b32.start.end [1/1] (short) (narrow) %v1359_v42, 8  ;;  %v1554_v42 = vcombine.high %v1537_v25, %v8836_v4 }
 0x3d4   :  { %3387 = vxpose.xlu0.b32.start.end [1/1] (short) (narrow) %v1383_v39, 8  ;;  %v1564_v39 = vrot.slane %v1061_v14, %v8126_v26 }
 0x3d6   :  { %3419 = vxpose.xlu1.b32.start.end [1/1] (short) (narrow) %v1406_v49, 8  ;;  %v1545_v49 = vrot.slane %v1522_v38, %v8131_v18  ;;  %v1579_v50 = vrot.slane %v1564_v39, %v8131_v18  ;;  %v1655_v38 = vcombine.high %v8229_v17, %v8836_v4 }
 0x3d8   :  { %3323 = vxpose.xlu0.b32.start.end [1/1] (short) (narrow) %v1356_v53, 8  ;;  %v1555_v53 = vcombine.high %v1545_v49, %v8836_v4  ;;  %v1602_v63 = vcombine.high %v1579_v50, %v8836_v4 }
 0x3da   :  { %3355 = vxpose.xlu1.b32.start.end [1/1] (short) (narrow) %v1360_v20, 8  ;;  %v1557_v20 = vcombine.high %v1061_v14, %v8836_v4 }
 0x3dc   :  { %3451 = vxpose.xlu0.b32.start.end [1/1] (short) (narrow) %v1390_v54, 8  ;;  %v1572_v54 = vcombine.high %v1564_v39, %v8836_v4 }
 0x3de   :  { %3483 = vxpose.xlu1.b32.start.end [1/1] (short) (narrow) %v1407_v61, 8  ;;  %v1552_v61 = vrot.slane %v1538_v48, %v8131_v18  ;;  %v1586_v57 = vrot.slane %v1572_v54, %v8131_v18 }
 0x3e0   :  { %3515 = vxpose.xlu0.b32.start.end [1/1] (short) (narrow) %v1398_v2, 8  ;;  %v1556_v44 = vcombine.high %v1552_v61, %v8836_v4 }
 0x3e2   :  { %3547 = vxpose.xlu1.b32.start.end [1/1] (short) (narrow) %v1408_v51, 8 }
 0x3e4   :  { %3643 = vxpose.xlu0.b32.start.end [1/1] (short) (narrow) %v1432_v3, 8  ;;  %v1571_v3 = vrot.slane %v1557_v20, %v8126_v26 }
 0x3e6   :  { %3675 = vxpose.xlu1.b32.start.end [1/1] (short) (narrow) %v1455_v32, 8  ;;  %v1613_v32 = vrot.slane %v8221_v52, %v8126_v26  ;;  %v1594_v10 = vrot.slane %v1571_v3, %v8131_v18 }
 0x3e8   :  { %3579 = vxpose.xlu0.b32.start.end [1/1] (short) (narrow) %v1405_v46, 8  ;;  %v1603_v46 = vcombine.high %v1586_v57, %v8836_v4  ;;  %v1604_v59 = vcombine.high %v1594_v10, %v8836_v4 }
 0x3ea   :  { %3611 = vxpose.xlu1.b32.start.end [1/1] (short) (narrow) %v1409_v60, 8  ;;  %v1628_v60 = vrot.slane %v1613_v32, %v8131_v18 }
 0x3ec   :  { %3707 = vxpose.xlu0.b32.start.end [1/1] (short) (narrow) %v1439_v24, 8  ;;  %v1651_v14 = vcombine.high %v1628_v60, %v8836_v4 }
 0x3ee   :  { %3739 = vxpose.xlu1.b32.start.end [1/1] (short) (narrow) %v1456_v12, 8  ;;  %v1587_v12 = vcombine.high %v1571_v3, %v8836_v4 }
 0x3f0   :  { %3771 = vxpose.xlu0.b32.start.end [1/1] (short) (narrow) %v1447_v13, 8 }
 0x3f2   :  { %3803 = vxpose.xlu1.b32.start.end [1/1] (short) (narrow) %v1457_v11, 8  ;;  %v1621_v11 = vcombine.high %v1613_v32, %v8836_v4 }
 0x3f4   :  { %3899 = vxpose.xlu0.b32.start.end [1/1] (short) (narrow) %v1481_v58, 8  ;;  %v1606_v58 = vcombine.high %v8221_v52, %v8836_v4  ;;  %v1662_v52 = vrot.slane %v8229_v17, %v8126_v26  ;;  %v1711_v17 = vrot.slane %v8235_v31, %v8126_v26 }
 0x3f6   :  { %3931 = vxpose.xlu1.b32.start.end [1/1] (short) (narrow) %v1504_v16, 8  ;;  %v1601_v16 = vrot.slane %v1587_v12, %v8131_v18  ;;  %v1620_v19 = vrot.slane %v1606_v58, %v8126_v26 }
 0x3f8   :  { %3835 = vxpose.xlu0.b32.start.end [1/1] (short) (narrow) %v1454_v22, 8  ;;  %v1605_v23 = vcombine.high %v1601_v16, %v8836_v4  ;;  %v1636_v5 = vcombine.high %v1620_v19, %v8836_v4 }
 0x3fa   :  { %3867 = vxpose.xlu1.b32.start.end [1/1] (short) (narrow) %v1458_v21, 8  ;;  %v1635_v21 = vrot.slane %v1621_v11, %v8131_v18  ;;  %v1650_v39 = vrot.slane %v1636_v5, %v8131_v18 }
 0x3fc   :  { %3963 = vxpose.xlu0.b32.start.end [1/1] (short) (narrow) %v1488_v27, 8 }
 0x3fe   :  { %3995 = vxpose.xlu1.b32.start.end [1/1] (short) (narrow) %v1505_v1, 8  ;;  %v1652_v1 = vcombine.high %v1635_v21, %v8836_v4 }
 0x400   :  { %4027 = vxpose.xlu0.b32.start.end [1/1] (short) (narrow) %v1496_v28, 8  ;;  %v1643_v28 = vrot.slane %v1620_v19, %v8131_v18 }
 0x402   :  { %4059 = vxpose.xlu1.b32.start.end [1/1] (short) (narrow) %v1506_v9, 8  ;;  %v1677_v9 = vrot.slane %v1662_v52, %v8131_v18 }
 0x404   :  { %4155 = vxpose.xlu0.b32.start.end [1/1] (short) (narrow) %v1530_v30, 8 }
 0x406   :  { %4187 = vxpose.xlu1.b32.start.end [1/1] (short) (narrow) %v1553_v34, 8  ;;  %v1653_v34 = vcombine.high %v1643_v28, %v8836_v4 }
 0x408   :  { %4091 = vxpose.xlu0.b32.start.end [1/1] (short) (narrow) %v1503_v56, 8  ;;  %v1700_v56 = vcombine.high %v1677_v9, %v8836_v4 }
 0x40a   :  { %4123 = vxpose.xlu1.b32.start.end [1/1] (short) (narrow) %v1507_v0, 8  ;;  %v1670_v0 = vcombine.high %v1662_v52, %v8836_v4 }
 0x40c   :  { %4219 = vxpose.xlu0.b32.start.end [1/1] (short) (narrow) %v1537_v25, 8  ;;  %v1684_v48 = vrot.slane %v1670_v0, %v8131_v18 }
 0x40e   :  { %4251 = vxpose.xlu1.b32.start.end [1/1] (short) (narrow) %v1554_v42, 8 }
 0x410   :  { %4283 = vxpose.xlu0.b32.start.end [1/1] (short) (narrow) %v1545_v49, 8  ;;  %v8254_v29 = vpop.trf.xlu0  ;;  %v1669_v49 = vrot.slane %v1655_v38, %v8126_v26 }
 0x412   :  { %4315 = vxpose.xlu1.b32.start.end [1/1] (short) (narrow) %v1555_v53, 8  ;;  %v1654_v53 = vcombine.high %v1650_v39, %v8836_v4  ;;  %v1692_v3 = vrot.slane %v1669_v49, %v8131_v18 }
 0x414   :  { %4411 = vxpose.xlu0.b32.start.end [1/1] (short) (narrow) %v1579_v50, 8  ;;  %v8261_v55 = vpop.trf.xlu0 }
 0x416   :  { %v8264_v2 = vpop.trf.xlu1  ;;  %4443 = vxpose.xlu1.b32.start.end [1/1] (short) (narrow) %v1602_v63, 8 }
 0x418   :  { %4347 = vxpose.xlu0.b32.start.end [1/1] (short) (narrow) %v1552_v61, 8  ;;  %v8267_v51 = vpop.trf.xlu0  ;;  %v1701_v61 = vcombine.high %v1684_v48, %v8836_v4 }
 0x41a   :  { %v8273_v6 = vpop.trf.xlu1  ;;  %4379 = vxpose.xlu1.b32.start.end [1/1] (short) (narrow) %v1556_v44, 8 }
 0x41c   :  { %4475 = vxpose.xlu0.b32.start.end [1/1] (short) (narrow) %v1586_v57, 8  ;;  %v8275_v7 = vpop.trf.xlu0  ;;  %v1726_v57 = vrot.slane %v1711_v17, %v8131_v18 }
 0x41e   :  { %v8279_v8 = vpop.trf.xlu1  ;;  %4507 = vxpose.xlu1.b32.start.end [1/1] (short) (narrow) %v1603_v46, 8  ;;  %v1702_v46 = vcombine.high %v1692_v3, %v8836_v4  ;;  %v1749_v12 = vcombine.high %v1726_v57, %v8836_v4 }
 0x420   :  { %4539 = vxpose.xlu0.b32.start.end [1/1] (short) (narrow) %v1594_v10, 8  ;;  %v8282_v24 = vpop.trf.xlu0  ;;  %v1685_v10 = vcombine.high %v1669_v49, %v8836_v4 }
 0x422   :  { %v8286_v13 = vpop.trf.xlu1  ;;  %4571 = vxpose.xlu1.b32.start.end [1/1] (short) (narrow) %v1604_v59, 8  ;;  %v1699_v58 = vrot.slane %v1685_v10, %v8131_v18 }
 0x424   :  { %4667 = vxpose.xlu0.b32.start.end [1/1] (short) (narrow) %v1628_v60, 8  ;;  %v8292_v15 = vpop.trf.xlu0 }
 0x426   :  { %v8295_v35 = vpop.trf.xlu1  ;;  %4699 = vxpose.xlu1.b32.start.end [1/1] (short) (narrow) %v1651_v14, 8 }
 0x428   :  { %4603 = vxpose.xlu0.b32.start.end [1/1] (short) (narrow) %v1601_v16, 8  ;;  %v8298_v22 = vpop.trf.xlu0 }
 0x42a   :  { %v8304_v27 = vpop.trf.xlu1  ;;  %4635 = vxpose.xlu1.b32.start.end [1/1] (short) (narrow) %v1605_v23, 8  ;;  %v1704_v23 = vcombine.high %v8235_v31, %v8836_v4 }
 0x42c   :  { %4731 = vxpose.xlu0.b32.start.end [1/1] (short) (narrow) %v1635_v21, 8  ;;  %v8306_v62 = vpop.trf.xlu0  ;;  %v1719_v21 = vcombine.high %v1711_v17, %v8836_v4  ;;  %v1718_v31 = vrot.slane %v1704_v23, %v8126_v26 }
 0x42e   :  { %v8310_v30 = vpop.trf.xlu1  ;;  %4763 = vxpose.xlu1.b32.start.end [1/1] (short) (narrow) %v1652_v1, 8  ;;  %v1733_v0 = vrot.slane %v1719_v21, %v8131_v18 }
 0x430   :  { %4795 = vxpose.xlu0.b32.start.end [1/1] (short) (narrow) %v1643_v28, 8  ;;  %v2891_v33 = vpop.trf.xlu0 }
 0x432   :  { %v2923_v36 = vpop.trf.xlu1  ;;  %4827 = vxpose.xlu1.b32.start.end [1/1] (short) (narrow) %v1653_v34, 8  ;;  %v1703_v34 = vcombine.high %v1699_v58, %v8836_v4 }
 0x434   :  { %4923 = vxpose.xlu0.b32.start.end [1/1] (short) (narrow) %v1677_v9, 8  ;;  %v8319_v25 = vpop.trf.xlu0  ;;  %v1760_v9 = vrot.slane %v8243_v37, %v8126_v26 }
 0x436   :  { %v8322_v42 = vpop.trf.xlu1  ;;  %4955 = vxpose.xlu1.b32.start.end [1/1] (short) (narrow) %v1700_v56, 8 }
 0x438   :  { %4859 = vxpose.xlu0.b32.start.end [1/1] (short) (narrow) %v1650_v39, 8  ;;  %v2955_v50 = vpop.trf.xlu0 }
 0x439   :  { %v6147_v63 = vcombine.low %v2891_v33, %v2955_v50  ;;  %v1775_v50 = vrot.slane %v1760_v9, %v8131_v18 }
 0x43a   :  { %v2987_v20 = vpop.trf.xlu1  ;;  %4891 = vxpose.xlu1.b32.start.end [1/1] (short) (narrow) %v1654_v53, 8 }
 0x43b   :  { %v6155_v60 = vcombine.low %v2923_v36, %v2987_v20  ;;  %v6154_v11 = vrot.slane %v6147_v63, %v8126_v26  ;;  %v8353_v63 = vrot.slane %v8249_v40, %v8126_v26  ;;  %v1741_v20 = vrot.slane %v1718_v31, %v8131_v18 }
 0x43c   :  { %4987 = vxpose.xlu0.b32.start.end [1/1] (short) (narrow) %v1684_v48, 8  ;;  %v3019_v54 = vpop.trf.xlu0 }
 0x43d   :  { %v6162_v16 = vrot.slane %v6155_v60, %v8126_v26 }
 0x43e   :  { %v3051_v44 = vpop.trf.xlu1  ;;  %5019 = vxpose.xlu1.b32.start.end [1/1] (short) (narrow) %v1701_v61, 8 }
 0x43f   :  { %v6179_v5 = vcombine.low %v6154_v11, %v6162_v16 }
 0x440   :  { %5051 = vxpose.xlu0.b32.start.end [1/1] (short) (narrow) %v1692_v3, 8  ;;  %v3147_v32 = vpop.trf.xlu0 }
 0x441   :  { %v6186_v53 = vrot.slane %v6179_v5, %v8131_v18 }
 0x442   :  { %v3179_v59 = vpop.trf.xlu1  ;;  %5083 = vxpose.xlu1.b32.start.end [1/1] (short) (narrow) %v1702_v46, 8  ;;  %v8364_v46 = vrot.slane %v8353_v63, %v8131_v18 }
 0x444   :  { %5179 = vxpose.xlu0.b32.start.end [1/1] (short) (narrow) %v1726_v57, 8  ;;  %v3083_v14 = vpop.trf.xlu0  ;;  %v1750_v57 = vcombine.high %v1733_v0, %v8836_v4  ;;  %v1847_v21 = vcombine.high %v8364_v46, %v8836_v4 }
 0x445   :  { %v6163_v19 = vcombine.low %v3019_v54, %v3083_v14  ;;  %v1734_v54 = vcombine.high %v1718_v31, %v8836_v4  ;;  %v1751_v14 = vcombine.high %v1741_v20, %v8836_v4 }
 0x446   :  { %v3115_v52 = vpop.trf.xlu1  ;;  %5211 = vxpose.xlu1.b32.start.end [1/1] (short) (narrow) %v1749_v12, 8 }
 0x447   :  { %v6170_v1 = vrot.slane %v6163_v19, %v8126_v26  ;;  %v6171_v28 = vcombine.low %v3051_v44, %v3115_v52  ;;  %v1748_v60 = vrot.slane %v1734_v54, %v8131_v18  ;;  %v1131_v19 = vcombine.high %v8135_v45, %v8836_v4 }
 0x448   :  { %5115 = vxpose.xlu0.b32.start.end [1/1] (short) (narrow) %v1699_v58, 8  ;;  %v3211_v33 = vpop.trf.xlu0 }
 0x449   :  { %v6178_v36 = vrot.slane %v6171_v28, %v8126_v26  ;;  %v6197_v56 = vcombine.low %v3147_v32, %v3211_v33  ;;  %v1753_v28 = vcombine.high %v8243_v37, %v8836_v4  ;;  %v1768_v33 = vcombine.high %v1760_v9, %v8836_v4 }
 0x44a   :  { %v3243_v38 = vpop.trf.xlu1  ;;  %5147 = vxpose.xlu1.b32.start.end [1/1] (short) (narrow) %v1703_v34, 8 }
 0x44b   :  { %v6187_v39 = vcombine.low %v6170_v1, %v6178_v36  ;;  %v6205_v32 = vcombine.low %v3179_v59, %v3243_v38  ;;  %v6204_v58 = vrot.slane %v6197_v56, %v8126_v26  ;;  %v1116_v59 = vcombine.high %v8128_v43, %v8836_v4 }
 0x44c   :  { %5243 = vxpose.xlu0.b32.start.end [1/1] (short) (narrow) %v1733_v0, 8  ;;  %v3275_v49 = vpop.trf.xlu0  ;;  %v1798_v43 = vcombine.high %v1775_v50, %v8836_v4  ;;  %v8384_v38 = vrot.slane %v1131_v19, %v8131_v18  ;;  %v1767_v37 = vrot.slane %v1753_v28, %v8126_v26 }
 0x44d   :  { %v6194_v48 = vrot.slane %v6187_v39, %v8131_v18  ;;  %v6212_v11 = vrot.slane %v6205_v32, %v8126_v26  ;;  %v1130_v56 = vrot.slane %v1116_v59, %v8126_v26  ;;  %v1782_v39 = vrot.slane %v1768_v33, %v8131_v18 }
 0x44e   :  { %v3307_v17 = vpop.trf.xlu1  ;;  %5435 = vxpose.xlu1.b32.start.end [1/1] (short) (narrow) %v1775_v50, 8 }
 0x44f   :  { %v8357_v61 = vcombine.low %v6186_v53, %v6194_v48  ;;  %v8359_v3 = vcombine.high %v6186_v53, %v6194_v48  ;;  %v6229_v5 = vcombine.low %v6204_v58, %v6212_v11  ;;  %v8392_v48 = vrot.slane %v1130_v56, %v8131_v18 }
 0x450   :  { %5307 = vxpose.xlu0.b32.start.end [1/1] (short) (narrow) %v1741_v20, 8  ;;  %v3403_v44 = vpop.trf.xlu0 }
 0x451   :  { %8852 = vst [vmem:[#allocation10_spill] sm:$0xff] %v8359_v3 }
 0x452   :  { %v3435_v10 = vpop.trf.xlu1  ;;  %5275 = vxpose.xlu1.b32.start.end [1/1] (short) (narrow) %v1750_v57, 8  ;;  %v1790_v57 = vrot.slane %v1767_v37, %v8131_v18 }
 0x454   :  { %5371 = vxpose.xlu0.b32.start.end [1/1] (short) (narrow) %v1748_v60, 8  ;;  %v3339_v12 = vpop.trf.xlu0 }
 0x455   :  { %v6213_v16 = vcombine.low %v3275_v49, %v3339_v12  ;;  %v6236_v49 = vrot.slane %v6229_v5, %v8131_v18  ;;  %v1074_v12 = vrot.slane %v8123_v41, %v8126_v26 }
 0x456   :  { %v3371_v23 = vpop.trf.xlu1  ;;  %5339 = vxpose.xlu1.b32.start.end [1/1] (short) (narrow) %v1751_v14, 8 }
 0x457   :  { %v6220_v52 = vrot.slane %v6213_v16, %v8126_v26  ;;  %v6221_v1 = vcombine.low %v3307_v17, %v3371_v23  ;;  %v1146_v17 = vcombine.high %v1130_v56, %v8836_v4  ;;  %v1752_v16 = vcombine.high %v1748_v60, %v8836_v4 }
 0x458   :  { %5723 = vxpose.xlu0.b32.start.end [1/1] (short) (narrow) %v1847_v21, 8  ;;  %v3467_v34 = vpop.trf.xlu0  ;;  %v1082_v21 = vcombine.high %v1074_v12, %v8836_v4 }
 0x459   :  { %v6228_v45 = vrot.slane %v6221_v1, %v8126_v26  ;;  %v6247_v36 = vcombine.low %v3403_v44, %v3467_v34  ;;  %v8404_v58 = vrot.slane %v1146_v17, %v8131_v18  ;;  %v8414_v1 = vrot.slane %v1074_v12, %v8131_v18 }
 0x45a   :  { %v3499_v31 = vpop.trf.xlu1  ;;  %5467 = vxpose.xlu1.b32.start.end [1/1] (short) (narrow) %v1798_v43, 8  ;;  %v1783_v12 = vcombine.high %v1767_v37, %v8836_v4  ;;  %v1817_v37 = vcombine.high %v8353_v63, %v8836_v4 }
 0x45b   :  { %v6237_v0 = vcombine.low %v6220_v52, %v6228_v45  ;;  %v6255_v32 = vcombine.low %v3435_v10, %v3499_v31  ;;  %v6254_v59 = vrot.slane %v6247_v36, %v8126_v26  ;;  %v1067_v10 = vcombine.high %v8123_v41, %v8836_v4 }
 0x45c   :  { %2171 = vxpose.xlu0.b32.start.end [1/1] (short) (narrow) %v8384_v38, 8  ;;  %v3531_v9 = vpop.trf.xlu0  ;;  %v8422_v36 = vrot.slane %v1082_v21, %v8131_v18 }
 0x45d   :  { %v6244_v50 = vrot.slane %v6237_v0, %v8131_v18  ;;  %v6262_v19 = vrot.slane %v6255_v32, %v8126_v26  ;;  %v1081_v45 = vrot.slane %v1067_v10, %v8126_v26  ;;  %v1799_v0 = vcombine.high %v1782_v39, %v8836_v4 }
 0x45e   :  { %v3563_v53 = vpop.trf.xlu1  ;;  %5499 = vxpose.xlu1.b32.start.end [1/1] (short) (narrow) %v1782_v39, 8  ;;  %v1800_v39 = vcombine.high %v1790_v57, %v8836_v4  ;;  %v1802_v10 = vcombine.high %v8249_v40, %v8836_v4  ;;  %v1020_v40 = vld [vmem:[%s8824_s0 + $0x88] sm:$0xff] }
 0x45f   :  { %v8395_v20 = vcombine.low %v6236_v49, %v6244_v50  ;;  %v8397_v54 = vcombine.high %v6236_v49, %v6244_v50  ;;  %v6279_v34 = vcombine.low %v6254_v59, %v6262_v19  ;;  %v1019_v59 = vld [vmem:[%s8824_s0 + $0x80] sm:$0xff] }
 0x460   :  { %2235 = vxpose.xlu0.b32.start.end [1/1] (short) (narrow) %v8392_v48, 8  ;;  %v3659_v44 = vpop.trf.xlu0 }
 0x461   :  { %8853 = vst [vmem:[#allocation11_spill] sm:$0xff] %v8397_v54 }
 0x462   :  { %v3691_v14 = vpop.trf.xlu1  ;;  %5563 = vxpose.xlu1.b32.start.end [1/1] (short) (narrow) %v1790_v57, 8 }
 0x464   :  { %2299 = vxpose.xlu0.b32.start.end [1/1] (short) (narrow) %v8404_v58, 8  ;;  %v3595_v11 = vpop.trf.xlu0 }
 0x465   :  { %v6263_v23 = vcombine.low %v3531_v9, %v3595_v11  ;;  %v6286_v9 = vrot.slane %v6279_v34, %v8131_v18 }
 0x466   :  { %v3627_v52 = vpop.trf.xlu1  ;;  %5403 = vxpose.xlu1.b32.start.end [1/1] (short) (narrow) %v1752_v16, 8  ;;  %v1003_v16 = vld [vmem:[%s8824_s0] sm:$0xff] }
 0x467   :  { %v6270_v28 = vrot.slane %v6263_v23, %v8126_v26  ;;  %v6271_v33 = vcombine.low %v3563_v53, %v3627_v52  ;;  %v8429_v53 = vrot.slane %v1081_v45, %v8131_v18  ;;  %v7454_v21 = vpack.i.bf16 %v1019_v59, %v1003_v16 }
 0x468   :  { %1851 = vxpose.xlu0.b32.start.end [1/1] (short) (narrow) %v8414_v1, 8  ;;  %v3723_v60 = vpop.trf.xlu0 }
 0x469   :  { %v6278_v43 = vrot.slane %v6271_v33, %v8126_v26  ;;  %v6297_v5 = vcombine.low %v3659_v44, %v3723_v60  ;;  %v1004_v60 = vld [vmem:[%s8824_s0 + $0x8] sm:$0xff] }
 0x46a   :  { %v3755_v41 = vpop.trf.xlu1  ;;  %5691 = vxpose.xlu1.b32.start.end [1/1] (short) (narrow) %v8364_v46, 8  ;;  %v1097_v46 = vcombine.high %v1081_v45, %v8836_v4  ;;  %v1816_v45 = vrot.slane %v1802_v10, %v8126_v26 }
 0x46b   :  { %v6287_v56 = vcombine.low %v6270_v28, %v6278_v43  ;;  %v6305_v11 = vcombine.low %v3691_v14, %v3755_v41  ;;  %v1797_v14 = vrot.slane %v1783_v12, %v8131_v18  ;;  %v6304_v52 = vrot.slane %v6297_v5, %v8126_v26 }
 0x46c   :  { %1915 = vxpose.xlu0.b32.start.end [1/1] (short) (narrow) %v8422_v36, 8  ;;  %v3787_v31 = vpop.trf.xlu0  ;;  %v8446_v23 = vrot.slane %v1097_v46, %v8131_v18  ;;  %v1831_v5 = vrot.slane %v1817_v37, %v8131_v18  ;;  %v1021_v46 = vld [vmem:[%s8824_s0 + $0x90] sm:$0xff]  ;;  %v1839_v59 = vrot.slane %v1816_v45, %v8131_v18  ;;  %v1006_v37 = vld [vmem:[%s8824_s0 + $0x18] sm:$0xff] }
 0x46d   :  { %v6294_v49 = vrot.slane %v6287_v56, %v8131_v18  ;;  %v6312_v28 = vrot.slane %v6305_v11, %v8126_v26  ;;  %v7456_v56 = vpack.i.bf16 %v1020_v40, %v1004_v60 }
 0x46e   :  { %v3819_v50 = vpop.trf.xlu1  ;;  %5531 = vxpose.xlu1.b32.start.end [1/1] (short) (narrow) %v1799_v0, 8 }
 0x46f   :  { %v8432_v17 = vcombine.low %v6286_v9, %v6294_v49  ;;  %v8434_v44 = vcombine.high %v6286_v9, %v6294_v49  ;;  %v1005_v49 = vld [vmem:[%s8824_s0 + $0x10] sm:$0xff] }
 0x470   :  { %1979 = vxpose.xlu0.b32.start.end [1/1] (short) (narrow) %v8429_v53, 8  ;;  %v3915_v32 = vpop.trf.xlu0  ;;  %v7458_v10 = vpack.i.bf16 %v1021_v46, %v1005_v49  ;;  %v1024_v46 = vld [vmem:[%s8824_s0 + $0xa8] sm:$0xff] }
 0x471   :  { %8854 = vst [vmem:[#allocation12_spill] sm:$0xff] %v8434_v44 }
 0x472   :  { %v3947_v19 = vpop.trf.xlu1  ;;  %5595 = vxpose.xlu1.b32.start.end [1/1] (short) (narrow) %v1800_v39, 8 }
 0x474   :  { %2043 = vxpose.xlu0.b32.start.end [1/1] (short) (narrow) %v8446_v23, 8  ;;  %v3851_v57 = vpop.trf.xlu0 }
 0x475   :  { %v6313_v33 = vcombine.low %v3787_v31, %v3851_v57  ;;  %v6329_v31 = vcombine.low %v6304_v52, %v6312_v28  ;;  %v1022_v57 = vld [vmem:[%s8824_s0 + $0x98] sm:$0xff] }
 0x476   :  { %v3883_v63 = vpop.trf.xlu1  ;;  %5627 = vxpose.xlu1.b32.start.end [1/1] (short) (narrow) %v1797_v14, 8 }
 0x477   :  { %v6320_v34 = vrot.slane %v6313_v33, %v8126_v26  ;;  %v6321_v43 = vcombine.low %v3819_v50, %v3883_v63  ;;  %v1801_v63 = vcombine.high %v1797_v14, %v8836_v4  ;;  %v1008_v14 = vld [vmem:[%s8824_s0 + $0x28] sm:$0xff] }
 0x478   :  { %v3979_v41 = vpop.trf.xlu0  ;;  %7455 = vxpose.xlu0.b32.start [1/16] (narrow) %v7454_v21, 32  ;;  %v6336_v21 = vrot.slane %v6329_v31, %v8131_v18 }
 0x479   :  { %v6328_v0 = vrot.slane %v6321_v43, %v8126_v26  ;;  %v6347_v9 = vcombine.low %v3915_v32, %v3979_v41  ;;  %v1007_v43 = vld [vmem:[%s8824_s0 + $0x20] sm:$0xff] }
 0x47a   :  { %v4011_v50 = vpop.trf.xlu1  ;;  %5755 = vxpose.xlu1.b32.start.end [1/1] (short) (narrow) %v1831_v5, 8  ;;  %v1023_v41 = vld [vmem:[%s8824_s0 + $0xa0] sm:$0xff] }
 0x47b   :  { %v6337_v39 = vcombine.low %v6320_v34, %v6328_v0  ;;  %v6354_v12 = vrot.slane %v6347_v9, %v8126_v26  ;;  %v6355_v11 = vcombine.low %v3947_v19, %v4011_v50  ;;  %v7460_v34 = vpack.i.bf16 %v1022_v57, %v1006_v37  ;;  %v1009_v57 = vld [vmem:[%s8824_s0 + $0x30] sm:$0xff] }
 0x47c   :  { %v4043_v16 = vpop.trf.xlu0  ;;  %7457 = vxpose.xlu0.b32.cont [2/16] (narrow) %v7456_v56, 32  ;;  %v1848_v0 = vcombine.high %v1831_v5, %v8836_v4  ;;  %v7462_v9 = vpack.i.bf16 %v1023_v41, %v1007_v43  ;;  %v1832_v5 = vcombine.high %v1816_v45, %v8836_v4  ;;  %v1010_v41 = vld [vmem:[%s8824_s0 + $0x38] sm:$0xff] }
 0x47d   :  { %v6362_v32 = vrot.slane %v6355_v11, %v8126_v26  ;;  %v6344_v52 = vrot.slane %v6337_v39, %v8131_v18 }
 0x47e   :  { %v4075_v19 = vpop.trf.xlu1  ;;  %5819 = vxpose.xlu1.b32.start.end [1/1] (short) (narrow) %v1839_v59, 8 }
 0x47f   :  { %v6379_v28 = vcombine.low %v6354_v12, %v6362_v32  ;;  %v8483_v33 = vcombine.low %v6336_v21, %v6344_v52  ;;  %v8485_v60 = vcombine.high %v6336_v21, %v6344_v52  ;;  %v1025_v21 = vld [vmem:[%s8824_s0 + $0xb0] sm:$0xff] }
 0x480   :  { %v4171_v40 = vpop.trf.xlu0  ;;  %7459 = vxpose.xlu0.b32.cont [3/16] (narrow) %v7458_v10, 32  ;;  %v1849_v10 = vcombine.high %v1839_v59, %v8836_v4  ;;  %v7466_v43 = vpack.i.bf16 %v1025_v21, %v1009_v57  ;;  %v1012_v57 = vld [vmem:[%s8824_s0 + $0x48] sm:$0xff] }
 0x481   :  { %8855 = vst [vmem:[#allocation13_spill] sm:$0xff] %v8485_v60  ;;  %v1028_v21 = vld [vmem:[%s8824_s0 + $0xc8] sm:$0xff] }
 0x482   :  { %v4203_v56 = vpop.trf.xlu1  ;;  %5659 = vxpose.xlu1.b32.start.end [1/1] (short) (narrow) %v1801_v63, 8 }
 0x484   :  { %v4107_v31 = vpop.trf.xlu0  ;;  %7461 = vxpose.xlu0.b32.cont [4/16] (narrow) %v7460_v34, 32  ;;  %v1846_v34 = vrot.slane %v1832_v5, %v8131_v18  ;;  %v1161_v5 = vcombine.high %v8139_v47, %v8836_v4  ;;  %v1162_v47 = vcombine.high %v8384_v38, %v8836_v4 }
 0x485   :  { %v6363_v49 = vcombine.low %v4043_v16, %v4107_v31  ;;  %v7464_v16 = vpack.i.bf16 %v1024_v46, %v1008_v14  ;;  %v1026_v31 = vld [vmem:[%s8824_s0 + $0xb8] sm:$0xff] }
 0x486   :  { %v4139_v50 = vpop.trf.xlu1  ;;  %5787 = vxpose.xlu1.b32.start.end [1/1] (short) (narrow) %v1848_v0, 8  ;;  %v6386_v0 = vrot.slane %v6379_v28, %v8131_v18  ;;  %v1027_v28 = vld [vmem:[%s8824_s0 + $0xc0] sm:$0xff] }
 0x487   :  { %v6370_v39 = vrot.slane %v6363_v49, %v8126_v26  ;;  %v6371_v12 = vcombine.low %v4075_v19, %v4139_v50 }
 0x488   :  { %v4235_v11 = vpop.trf.xlu0  ;;  %7463 = vxpose.xlu0.b32.cont [5/16] (narrow) %v7462_v9, 32 }
 0x489   :  { %v6378_v32 = vrot.slane %v6371_v12, %v8126_v26  ;;  %v6397_v37 = vcombine.low %v4171_v40, %v4235_v11  ;;  %v7468_v12 = vpack.i.bf16 %v1026_v31, %v1010_v41  ;;  %v1011_v11 = vld [vmem:[%s8824_s0 + $0x40] sm:$0xff]  ;;  %v1029_v41 = vld [vmem:[%s8824_s0 + $0xd0] sm:$0xff] }
 0x48a   :  { %v4267_v52 = vpop.trf.xlu1  ;;  %5851 = vxpose.xlu1.b32.start.end [1/1] (short) (narrow) %v1849_v10, 8 }
 0x48b   :  { %v6387_v19 = vcombine.low %v6370_v39, %v6378_v32  ;;  %v6404_v59 = vrot.slane %v6397_v37, %v8126_v26  ;;  %v6405_v63 = vcombine.low %v4203_v56, %v4267_v52  ;;  %v1850_v39 = vcombine.high %v1846_v34, %v8836_v4 }
 0x48c   :  { %v4299_v45 = vpop.trf.xlu0  ;;  %7465 = vxpose.xlu0.b32.cont [6/16] (narrow) %v7464_v16, 32  ;;  %v7470_v32 = vpack.i.bf16 %v1027_v28, %v1011_v11  ;;  %v1014_v11 = vld [vmem:[%s8824_s0 + $0x58] sm:$0xff] }
 0x48d   :  { %v6412_v40 = vrot.slane %v6405_v63, %v8126_v26  ;;  %v6394_v9 = vrot.slane %v6387_v19, %v8131_v18  ;;  %v1030_v28 = vld [vmem:[%s8824_s0 + $0xd8] sm:$0xff] }
 0x48e   :  { %v4331_v56 = vpop.trf.xlu1  ;;  %5883 = vxpose.xlu1.b32.start.end [1/1] (short) (narrow) %v1846_v34, 8  ;;  %v7472_v34 = vpack.i.bf16 %v1028_v21, %v1012_v57  ;;  %v1164_v21 = vcombine.high %v8404_v58, %v8836_v4  ;;  %v1016_v58 = vld [vmem:[%s8824_s0 + $0x68] sm:$0xff] }
 0x48f   :  { %v6429_v49 = vcombine.low %v6404_v59, %v6412_v40  ;;  %v8522_v14 = vcombine.low %v6386_v0, %v6394_v9  ;;  %v8524_v46 = vcombine.high %v6386_v0, %v6394_v9  ;;  %v1013_v40 = vld [vmem:[%s8824_s0 + $0x50] sm:$0xff] }
 0x490   :  { %v4427_v50 = vpop.trf.xlu0  ;;  %7467 = vxpose.xlu0.b32.cont [7/16] (narrow) %v7466_v43, 32 }
 0x491   :  { %8856 = vst [vmem:[#allocation14_spill] sm:$0xff] %v8524_v46 }
 0x492   :  { %v4459_v10 = vpop.trf.xlu1  ;;  %5915 = vxpose.xlu1.b32.start.end [1/1] (short) (narrow) %v1850_v39, 8  ;;  %v1163_v39 = vcombine.high %v8392_v48, %v8836_v4 }
 0x494   :  { %v4363_v16 = vpop.trf.xlu0  ;;  %7469 = vxpose.xlu0.b32.cont [8/16] (narrow) %v7468_v12, 32 }
 0x495   :  { %v6413_v37 = vcombine.low %v4299_v45, %v4363_v16 }
 0x496   :  { %v4395_v52 = vpop.trf.xlu1  ;;  %2139 = vxpose.xlu1.b32.start.end [1/1] (short) (narrow) %v1161_v5, 8  ;;  %v6436_v5 = vrot.slane %v6429_v49, %v8131_v18  ;;  %v1031_v49 = vld [vmem:[%s8824_s0 + $0xe0] sm:$0xff] }
 0x497   :  { %v6420_v19 = vrot.slane %v6413_v37, %v8126_v26  ;;  %v6421_v59 = vcombine.low %v4331_v56, %v4395_v52  ;;  %v7476_v52 = vpack.i.bf16 %v1030_v28, %v1014_v11 }
 0x498   :  { %v4491_v63 = vpop.trf.xlu0  ;;  %7471 = vxpose.xlu0.b32.cont [9/16] (narrow) %v7470_v32, 32 }
 0x499   :  { %v6428_v45 = vrot.slane %v6421_v59, %v8126_v26  ;;  %v6447_v43 = vcombine.low %v4427_v50, %v4491_v63  ;;  %v7474_v50 = vpack.i.bf16 %v1029_v41, %v1013_v40 }
 0x49a   :  { %v4523_v31 = vpop.trf.xlu1  ;;  %2203 = vxpose.xlu1.b32.start.end [1/1] (short) (narrow) %v1162_v47, 8  ;;  %v1112_v47 = vcombine.high %v8414_v1, %v8836_v4  ;;  %v1113_v1 = vcombine.high %v8422_v36, %v8836_v4 }
 0x49b   :  { %v6437_v0 = vcombine.low %v6420_v19, %v6428_v45  ;;  %v6454_v9 = vrot.slane %v6447_v43, %v8126_v26  ;;  %v6455_v56 = vcombine.low %v4459_v10, %v4523_v31  ;;  %v1015_v19 = vld [vmem:[%s8824_s0 + $0x60] sm:$0xff]  ;;  %v1032_v43 = vld [vmem:[%s8824_s0 + $0xe8] sm:$0xff] }
 0x49c   :  { %v4555_v38 = vpop.trf.xlu0  ;;  %7473 = vxpose.xlu0.b32.cont [10/16] (narrow) %v7472_v34, 32  ;;  %v7478_v34 = vpack.i.bf16 %v1031_v49, %v1015_v19 }
 0x49d   :  { %v6462_v12 = vrot.slane %v6455_v56, %v8126_v26  ;;  %v6444_v10 = vrot.slane %v6437_v0, %v8131_v18 }
 0x49e   :  { %v4587_v16 = vpop.trf.xlu1  ;;  %2267 = vxpose.xlu1.b32.start.end [1/1] (short) (narrow) %v1163_v39, 8  ;;  %v1017_v39 = vld [vmem:[%s8824_s0 + $0x70] sm:$0xff] }
 0x49f   :  { %v6479_v32 = vcombine.low %v6454_v9, %v6462_v12  ;;  %v8563_v48 = vcombine.low %v6436_v5, %v6444_v10  ;;  %v8565_v37 = vcombine.high %v6436_v5, %v6444_v10  ;;  %v7480_v9 = vpack.i.bf16 %v1032_v43, %v1016_v58 }
 0x4a0   :  { %v4683_v57 = vpop.trf.xlu0  ;;  %7475 = vxpose.xlu0.b32.cont [11/16] (narrow) %v7474_v50, 32  ;;  %v1033_v50 = vld [vmem:[%s8824_s0 + $0xf0] sm:$0xff]  ;;  %v1114_v10 = vcombine.high %v8429_v53, %v8836_v4 }
 0x4a1   :  { %8857 = vst [vmem:[#allocation15_spill] sm:$0xff] %v8565_v37  ;;  %v6486_v19 = vrot.slane %v6479_v32, %v8131_v18 }
 0x4a2   :  { %v4715_v59 = vpop.trf.xlu1  ;;  %2331 = vxpose.xlu1.b32.start.end [1/1] (short) (narrow) %v1164_v21, 8  ;;  %v1018_v21 = vld [vmem:[%s8824_s0 + $0x78] sm:$0xff] }
 0x4a4   :  { %v4619_v63 = vpop.trf.xlu0  ;;  %7477 = vxpose.xlu0.b32.cont [12/16] (narrow) %v7476_v52, 32  ;;  %v1034_v52 = vld [vmem:[%s8824_s0 + $0xf8] sm:$0xff] }
 0x4a5   :  { %v6463_v45 = vcombine.low %v4555_v38, %v4619_v63  ;;  %v7484_v58 = vpack.i.bf16 %v1034_v52, %v1018_v21 }
 0x4a6   :  { %v4651_v40 = vpop.trf.xlu1  ;;  %1883 = vxpose.xlu1.b32.start.end [1/1] (short) (narrow) %v1112_v47, 8 }
 0x4a7   :  { %v6470_v41 = vrot.slane %v6463_v45, %v8126_v26  ;;  %v6471_v31 = vcombine.low %v4587_v16, %v4651_v40  ;;  %v7482_v16 = vpack.i.bf16 %v1033_v50, %v1017_v39  ;;  %v1115_v45 = vcombine.high %v8446_v23, %v8836_v4 }
 0x4a8   :  { %v4747_v0 = vpop.trf.xlu0  ;;  %7479 = vxpose.xlu0.b32.cont [13/16] (narrow) %v7478_v34, 32 }
 0x4a9   :  { %v6478_v56 = vrot.slane %v6471_v31, %v8126_v26  ;;  %v6497_v38 = vcombine.low %v4683_v57, %v4747_v0 }
 0x4aa   :  { %v4779_v12 = vpop.trf.xlu1  ;;  %1947 = vxpose.xlu1.b32.start.end [1/1] (short) (narrow) %v1113_v1, 8 }
 0x4ab   :  { %v6487_v11 = vcombine.low %v6470_v41, %v6478_v56  ;;  %v6504_v28 = vrot.slane %v6497_v38, %v8126_v26  ;;  %v6505_v5 = vcombine.low %v4715_v59, %v4779_v12 }
 0x4ac   :  { %v4811_v36 = vpop.trf.xlu0  ;;  %7481 = vxpose.xlu0.b32.cont [14/16] (narrow) %v7480_v9, 32 }
 0x4ad   :  { %v6512_v57 = vrot.slane %v6505_v5, %v8126_v26  ;;  %v6494_v49 = vrot.slane %v6487_v11, %v8131_v18 }
 0x4ae   :  { %v4843_v59 = vpop.trf.xlu1  ;;  %2011 = vxpose.xlu1.b32.start.end [1/1] (short) (narrow) %v1114_v10, 8 }
 0x4af   :  { %v6529_v63 = vcombine.low %v6504_v28, %v6512_v57  ;;  %v8605_v53 = vcombine.low %v6486_v19, %v6494_v49  ;;  %v8607_v47 = vcombine.high %v6486_v19, %v6494_v49 }
 0x4b0   :  { %v4939_v34 = vpop.trf.xlu0  ;;  %7483 = vxpose.xlu0.b32.cont [15/16] (narrow) %v7482_v16, 32 }
 0x4b1   :  { %8858 = vst [vmem:[#allocation16_spill] sm:$0xff] %v8607_v47  ;;  %v6536_v28 = vrot.slane %v6529_v63, %v8131_v18 }
 0x4b2   :  { %v4971_v43 = vpop.trf.xlu1  ;;  %2075 = vxpose.xlu1.b32.start.end [1/1] (short) (narrow) %v1115_v45, 8 }
 0x4b4   :  { %v4875_v40 = vpop.trf.xlu0  ;;  %7485 = vxpose.xlu0.b32.end [16/16] (narrow) %v7484_v58, 32 }
 0x4b5   :  { %v6513_v32 = vcombine.low %v4811_v36, %v4875_v40 }
 0x4b6   :  { %v4907_v41 = vpop.trf.xlu1 }
 0x4b7   :  { %v6520_v31 = vrot.slane %v6513_v32, %v8126_v26  ;;  %v6521_v0 = vcombine.low %v4843_v59, %v4907_v41 }
 0x4b8   :  { %v5003_v1 = vpop.trf.xlu0 }
 0x4b9   :  { %v6528_v9 = vrot.slane %v6521_v0, %v8126_v26  ;;  %v6547_v56 = vcombine.low %v4939_v34, %v5003_v1 }
 0x4ba   :  { %v5035_v38 = vpop.trf.xlu1 }
 0x4bb   :  { %v6537_v39 = vcombine.low %v6520_v31, %v6528_v9  ;;  %v6554_v50 = vrot.slane %v6547_v56, %v8126_v26  ;;  %v6555_v23 = vcombine.low %v4971_v43, %v5035_v38 }
 0x4bc   :  { %v5067_v12 = vpop.trf.xlu0 }
 0x4bd   :  { %v6562_v11 = vrot.slane %v6555_v23, %v8126_v26  ;;  %v6544_v5 = vrot.slane %v6537_v39, %v8131_v18 }
 0x4be   :  { %v5099_v36 = vpop.trf.xlu1 }
 0x4bf   :  { %v6579_v10 = vcombine.low %v6554_v50, %v6562_v11  ;;  %v8617_v16 = vcombine.low %v6536_v28, %v6544_v5  ;;  %v8619_v57 = vcombine.high %v6536_v28, %v6544_v5 }
 0x4c0   :  { %v5195_v21 = vpop.trf.xlu0 }
 0x4c1   :  { %8859 = vst [vmem:[#allocation17_spill] sm:$0xff] %v8619_v57  ;;  %v6586_v31 = vrot.slane %v6579_v10, %v8131_v18 }
 0x4c2   :  { %v5227_v52 = vpop.trf.xlu1 }
 0x4c4   :  { %v5131_v19 = vpop.trf.xlu0 }
 0x4c5   :  { %v6563_v49 = vcombine.low %v5067_v12, %v5131_v19 }
 0x4c6   :  { %v5163_v59 = vpop.trf.xlu1 }
 0x4c7   :  { %v6570_v34 = vrot.slane %v6563_v49, %v8126_v26  ;;  %v6571_v45 = vcombine.low %v5099_v36, %v5163_v59 }
 0x4c8   :  { %v5259_v58 = vpop.trf.xlu0 }
 0x4c9   :  { %v6578_v43 = vrot.slane %v6571_v45, %v8126_v26  ;;  %v6597_v63 = vcombine.low %v5195_v21, %v5259_v58 }
 0x4ca   :  { %v8623_v40 = vpop.trf.xlu1 }
 0x4cb   :  { %v6587_v32 = vcombine.low %v6570_v34, %v6578_v43  ;;  %v6604_v9 = vrot.slane %v6597_v63, %v8126_v26 }
 0x4cc   :  { %v5323_v41 = vpop.trf.xlu0 }
 0x4cd   :  { %v6594_v0 = vrot.slane %v6587_v32, %v8131_v18 }
 0x4ce   :  { %v5291_v1 = vpop.trf.xlu1 }
 0x4cf   :  { %v6605_v56 = vcombine.low %v5227_v52, %v5291_v1  ;;  %v8628_v38 = vcombine.low %v6586_v31, %v6594_v0  ;;  %v8630_v39 = vcombine.high %v6586_v31, %v6594_v0 }
 0x4d0   :  { %v5387_v50 = vpop.trf.xlu0 }
 0x4d1   :  { %8860 = vst [vmem:[#allocation18_spill] sm:$0xff] %v8630_v39  ;;  %v6612_v23 = vrot.slane %v6605_v56, %v8126_v26  ;;  %v6613_v12 = vcombine.low %v5323_v41, %v5387_v50 }
 0x4d2   :  { %v5355_v11 = vpop.trf.xlu1 }
 0x4d3   :  { %v6629_v28 = vcombine.low %v6604_v9, %v6612_v23  ;;  %v6620_v45 = vrot.slane %v6613_v12, %v8126_v26 }
 0x4d4   :  { %v5739_v5 = vpop.trf.xlu0 }
 0x4d5   :  { %v6636_v0 = vrot.slane %v6629_v28, %v8131_v18 }
 0x4d6   :  { %v5483_v36 = vpop.trf.xlu1 }
 0x4d8   :  { %v8633_v21 = vpop.trf.xlu0 }
 0x4da   :  { %v5515_v10 = vpop.trf.xlu1 }
 0x4db   :  { %v6647_v57 = vcombine.low %v8623_v40, %v5515_v10 }
 0x4dc   :  { %v8635_v19 = vpop.trf.xlu0 }
 0x4de   :  { %v5579_v49 = vpop.trf.xlu1 }
 0x4e0   :  { %v8637_v59 = vpop.trf.xlu0 }
 0x4e2   :  { %v5419_v34 = vpop.trf.xlu1 }
 0x4e3   :  { %v6621_v58 = vcombine.low %v5355_v11, %v5419_v34 }
 0x4e4   :  { %v8642_v43 = vpop.trf.xlu0 }
 0x4e5   :  { %v6628_v63 = vrot.slane %v6621_v58, %v8126_v26 }
 0x4e6   :  { %v5707_v32 = vpop.trf.xlu1 }
 0x4e7   :  { %v6637_v41 = vcombine.low %v6620_v45, %v6628_v63 }
 0x4e8   :  { %v8645_v31 = vpop.trf.xlu0 }
 0x4e9   :  { %v6644_v1 = vrot.slane %v6637_v41, %v8131_v18 }
 0x4ea   :  { %v5547_v56 = vpop.trf.xlu1 }
 0x4eb   :  { %v6645_v50 = vcombine.low %v6636_v0, %v6644_v1  ;;  %v8651_v23 = vcombine.high %v6636_v0, %v6644_v1  ;;  %v6655_v46 = vcombine.low %v5483_v36, %v5547_v56  ;;  %v5997_v56 = vcombine.low %v8254_v29, %v8633_v21 }
 0x4ec   :  { %v8653_v12 = vpop.trf.xlu0  ;;  %v6063_v29 = vcombine.low %v8275_v7, %v8292_v15  ;;  %v6071_v21 = vcombine.low %v8279_v8, %v8295_v35  ;;  %v6047_v7 = vcombine.low %v8261_v55, %v8267_v51 }
 0x4ed   :  { %8861 = vst [vmem:[#allocation19_spill] sm:$0xff] %v8651_v23 }
 0x4ee   :  { %v5611_v11 = vpop.trf.xlu1 }
 0x4f0   :  { %v8655_v34 = vpop.trf.xlu0 }
 0x4f2   :  { %v5643_v58 = vpop.trf.xlu1 }
 0x4f3   :  { %v6663_v37 = vcombine.low %v5579_v49, %v5643_v58  ;;  %v6113_v58 = vcombine.low %v8306_v62, %v8319_v25  ;;  %v6105_v62 = vcombine.low %v8286_v13, %v8304_v27  ;;  %v8866_v25 = vcombine.low %v8635_v19, %v8637_v59 }
 0x4f4   :  { %v8657_v45 = vpop.trf.xlu0  ;;  %v6078_v27 = vrot.slane %v6071_v21, %v8126_v26 }
 0x4f5   :  { %8862 = vst [vmem:[#allocation20_spill] sm:$0xff] %v8657_v45  ;;  %v7487_v63 = vunpack.i.l.bf16 %v8657_v45  ;;  %v6120_v13 = vrot.slane %v6113_v58, %v8126_v26  ;;  %v6112_v51 = vrot.slane %v6105_v62, %v8126_v26  ;;  %v8877_v62 = vld [vmem:[#allocation14_spill] sm:$0xff] }
 0x4f6   :  { %v5771_v28 = vpop.trf.xlu1 }
 0x4f7   :  { %7390 = vmatprep.mubr.f32.mxu0 %v7487_v63  ;;  %v6697_v47 = vcombine.low %v5707_v32, %v5771_v28  ;;  %v6004_v28 = vrot.slane %v5997_v56, %v8126_v26 }
 0x4f8   :  { %v8660_v41 = vpop.trf.xlu0 }
 0x4f9   :  { %8863 = vst [vmem:[#allocation21_spill] sm:$0xff] %v8660_v41  ;;  %v6704_v41 = vrot.slane %v6697_v47, %v8126_v26 }
 0x4fa   :  { %v5835_v4 = vpop.trf.xlu1 }
 0x4fc   :  { %v8662_v9 = vpop.trf.xlu0 }
 0x4fd   :  { %8864 = vst [vmem:[#allocation22_spill] sm:$0xff] %v8662_v9  ;;  %v6662_v9 = vrot.slane %v6655_v46, %v8126_v26 }
 0x4fe   :  { %v5675_v52 = vpop.trf.xlu1 }
 0x4ff   :  { %v6671_v54 = vcombine.low %v5611_v11, %v5675_v52 }
 0x500   :  { %v8664_v0 = vpop.trf.xlu0 }
 0x501   :  { %8865 = vst [vmem:[#allocation23_spill] sm:$0xff] %v8664_v0  ;;  %v6678_v63 = vrot.slane %v6671_v54, %v8126_v26  ;;  %v6670_v0 = vrot.slane %v6663_v37, %v8126_v26 }
 0x502   :  { %v5803_v1 = vpop.trf.xlu1 }
 0x503   :  { %v6705_v44 = vcombine.low %v5739_v5, %v5803_v1  ;;  %v6654_v5 = vrot.slane %v6647_v57, %v8126_v26  ;;  %v6687_v36 = vcombine.low %v6670_v0, %v6678_v63 }
 0x505   :  { %v6712_v39 = vrot.slane %v6705_v44, %v8126_v26  ;;  %v6679_v10 = vcombine.low %v6654_v5, %v6662_v9  ;;  %v8682_v46 = vrot.slane %v6687_v36, %v8131_v18 }
 0x506   :  { %v5867_v3 = vpop.trf.xlu1 }
 0x507   :  { %v6729_v49 = vcombine.low %v6704_v41, %v6712_v39  ;;  %v8687_v47 = vrot.slane %v6679_v10, %v8131_v18  ;;  %v8867_v10 = vcombine.low %v8642_v43, %v8645_v31 }
 0x509   :  { %v6695_v39 = vcombine.low %v8687_v47, %v8682_v46 }
 0x50a   :  { %v5899_v60 = vpop.trf.xlu1 }
 0x50b   :  { %v6713_v23 = vcombine.low %v5835_v4, %v5899_v60  ;;  %v8676_v4 = vrot.slane %v6729_v49, %v8131_v18 }
 0x50d   :  { %v6720_v32 = vrot.slane %v6713_v23, %v8126_v26 }
 0x50e   :  { %v5931_v45 = vpop.trf.xlu1 }
 0x50f   :  { %v6721_v52 = vcombine.low %v5867_v3, %v5931_v45  ;;  %v6121_v45 = vcombine.low %v8310_v30, %v8322_v42  ;;  %v6020_v42 = vrot.slane %v8866_v25, %v8126_v26  ;;  %v8879_v25 = vld [vmem:[#allocation12_spill] sm:$0xff] }
 0x511   :  { %v6728_v40 = vrot.slane %v6721_v52, %v8126_v26  ;;  %v6128_v15 = vrot.slane %v6121_v45, %v8126_v26  ;;  %v8870_v45 = vld [vmem:[#allocation23_spill] sm:$0xff] }
 0x512   :  { %v2155_v54 = vpop.trf.xlu1 }
 0x513   :  { %v6737_v44 = vcombine.low %v6720_v32, %v6728_v40  ;;  %v6137_v59 = vcombine.low %v6120_v13, %v6128_v15  ;;  %v7505_v15 = vunpack.i.h.bf16 %v8870_v45 }
 0x515   :  { %v8679_v60 = vrot.slane %v6737_v44, %v8131_v18  ;;  %v5954_v44 = vrot.slane %v8867_v10, %v8126_v26 }
 0x516   :  { %v2219_v3 = vpop.trf.xlu1 }
 0x517   :  { %v6745_v37 = vcombine.low %v8676_v4, %v8679_v60  ;;  %v6005_v57 = vcombine.low %v2155_v54, %v2219_v3 }
 0x519   :  { %7358 = vmatprep.subr.mxu0 %v6745_v37  ;;  %v6012_v23 = vrot.slane %v6005_v57, %v8126_v26 }
 0x51a   :  { %v2283_v9 = vpop.trf.xlu1  ;;  %7359 = vmatpush3.msra.mxu0 %v6745_v37 }
 0x51b   :  { %7360 = vmatprep.subr.mxu0 %v6695_v39  ;;  %v6029_v30 = vcombine.low %v6004_v28, %v6012_v23  ;;  %v7502_v28 = vunpack.i.l.bf16 %v8870_v45 }
 0x51c   :  { %7361 = vmatpush3.msra.mxu0 %v6695_v39 }
 0x51d   :  { %7362 = vmatprep.subr.mxu0 %v6645_v50 }
 0x51e   :  { %v2347_v11 = vpop.trf.xlu1  ;;  %7363 = vmatpush3.msra.mxu0 %v6645_v50  ;;  %v6097_v50 = vcombine.low %v8282_v24, %v8298_v22  ;;  %v6055_v24 = vcombine.low %v8264_v2, %v8273_v6  ;;  %v6070_v22 = vrot.slane %v6063_v29, %v8126_v26  ;;  %v6036_v2 = vrot.slane %v6029_v30, %v8131_v18  ;;  %v8871_v29 = vld [vmem:[#allocation20_spill] sm:$0xff]  ;;  %v8878_v30 = vld [vmem:[#allocation13_spill] sm:$0xff] }
 0x51f   :  { %v6021_v41 = vcombine.low %v2283_v9, %v2347_v11  ;;  %7364 = vmatprep.subr.mxu0 %v8628_v38  ;;  %v8868_v9 = vld [vmem:[#allocation21_spill] sm:$0xff]  ;;  %v8869_v11 = vld [vmem:[#allocation22_spill] sm:$0xff]  ;;  %v7490_v21 = vunpack.i.h.bf16 %v8871_v29 }
 0x520   :  { %7365 = vmatpush3.msra.mxu0 %v8628_v38  ;;  %v6104_v55 = vrot.slane %v6097_v50, %v8126_v26  ;;  %v6062_v19 = vrot.slane %v6055_v24, %v8126_v26  ;;  %v6087_v63 = vcombine.low %v6070_v22, %v6078_v27  ;;  %v7492_v56 = vunpack.i.l.bf16 %v8868_v9  ;;  %v8872_v50 = vld [vmem:[#allocation19_spill] sm:$0xff] }
 0x521   :  { %v6028_v0 = vrot.slane %v6021_v41, %v8126_v26  ;;  %7366 = vmatprep.subr.mxu0 %v8617_v16  ;;  %v7497_v58 = vunpack.i.l.bf16 %v8869_v11  ;;  %v6696_v41 = vcombine.high %v8687_v47, %v8682_v46  ;;  %v8875_v46 = vld [vmem:[#allocation16_spill] sm:$0xff]  ;;  %v8876_v47 = vld [vmem:[#allocation15_spill] sm:$0xff]  ;;  %v7495_v24 = vunpack.i.h.bf16 %v8868_v9 }
 0x522   :  { %v1899_v8 = vpop.trf.xlu1  ;;  %7367 = vmatpush3.msra.mxu0 %v8617_v16  ;;  %v6054_v16 = vrot.slane %v6047_v7, %v8126_v26  ;;  %v6129_v52 = vcombine.low %v6104_v55, %v6112_v51  ;;  %v6094_v54 = vrot.slane %v6087_v63, %v8131_v18  ;;  %v7500_v13 = vunpack.i.h.bf16 %v8869_v11  ;;  %v7055_v22 = vld [vmem:[%s8832_s8 + $0x10] sm:$0xff]  ;;  %v7054_v55 = vld [vmem:[%s8832_s8 + $0x8] sm:$0xff]  ;;  %v7053_v51 = vld [vmem:[%s8832_s8] sm:$0xff] }
 0x523   :  { %v6037_v35 = vcombine.low %v6020_v42, %v6028_v0  ;;  %7368 = vmatprep.subr.mxu0 %v8605_v53  ;;  %v8880_v42 = vld [vmem:[#allocation11_spill] sm:$0xff]  ;;  %v8881_v0 = vld [vmem:[#allocation10_spill] sm:$0xff]  ;;  %v8882_v27 = vmov 0.0  }
 0x524   :  { %7369 = vmatpush3.msra.mxu0 %v8605_v53  ;;  %v6079_v49 = vcombine.low %v6054_v16, %v6062_v19  ;;  %v6136_v40 = vrot.slane %v6129_v52, %v8131_v18 }
 0x525   :  { %7370 = vmatprep.subr.mxu0 %v8563_v48  ;;  %v6044_v6 = vrot.slane %v6037_v35, %v8131_v18  ;;  %v7056_v35 = vld [vmem:[%s8832_s8 + $0x18] sm:$0xff]  ;;  %s7623_s8 = smov [#allocation6]  }
 0x526   :  { %v1963_v38 = vpop.trf.xlu1  ;;  %7371 = vmatpush3.msra.mxu0 %v8563_v48  ;;  %v8742_v48 = vrot.slane %v6137_v59, %v8131_v18  ;;  %7435 = vmatpush3.msra.mxu1 %v7056_v35  ;;  %s7155_s12 = sshll.u32 %s7623_s8, 4  ;;  %s7156_s12 = int_to_ptr.vmem [resolvable:$true] %s7155_s12 }
 0x527   :  { %7372 = vmatprep.subr.mxu0 %v8522_v14  ;;  %v6045_v53 = vcombine.low %v6036_v2, %v6044_v6  ;;  %v8735_v1 = vcombine.high %v6036_v2, %v6044_v6  ;;  %v5955_v5 = vcombine.low %v1899_v8, %v1963_v38  ;;  %7436 = vmatprep.subr.mxu1 %v8882_v27  ;;  %s7574_s13 = scalar_lea.vmem %s7156_s12, 32  ;;  %p7579_p1 = scmp.lt.s32.totalorder %s7156_s12, %s7156_s12 }
 0x528   :  { %7373 = vmatpush3.msra.mxu0 %v8522_v14  ;;  %v5963_v14 = vcombine.low %v8653_v12, %v8655_v34  ;;  %v6145_v3 = vcombine.low %v6136_v40, %v8742_v48  ;;  %v6086_v12 = vrot.slane %v6079_v49, %v8131_v18  ;;  %v6146_v7 = vcombine.high %v6136_v40, %v8742_v48  ;;  %p7575_p0 = scmp.ne.s32.totalorder %s7156_s12, %s7574_s13  ;;  %p7580_p2 = scmp.lt.s32.totalorder %s7574_s13, %s7574_s13 }
 0x529   :  { %7374 = vmatprep.subr.mxu0 %v8483_v33  ;;  %v5962_v32 = vrot.slane %v5955_v5, %v8126_v26  ;;  %7437 = vmatpush3.msra.mxu1 %v7055_v22 }
 0x52a   :  { %v2027_v36 = vpop.trf.xlu1  ;;  %7375 = vmatpush3.msra.mxu0 %v8483_v33  ;;  %v5970_v37 = vrot.slane %v5963_v14, %v8126_v26  ;;  %v6096_v8 = vcombine.high %v6086_v12, %v6094_v54  ;;  %7438 = vmatprep.subr.mxu1 %v8882_v27  ;;  %p7581_p3 = por %p7580_p2, %p7579_p1 }
 0x52b   :  { %7376 = vmatprep.subr.mxu0 %v8432_v17  ;;  %v5979_v34 = vcombine.low %v5954_v44, %v5962_v32  ;;  %7439 = vmatpush3.msra.mxu1 %v7054_v55 }
 0x52c   :  { %7377 = vmatpush3.msra.mxu0 %v8432_v17  ;;  %7440 = vmatprep.subr.mxu1 %v8882_v27  ;;  %p7582_p4 = pnand %p7581_p3, %p7575_p0 }
 0x52d   :  { %7378 = vmatprep.subr.mxu0 %v8395_v20  ;;  %v5986_v43 = vrot.slane %v5979_v34, %v8131_v18  ;;  %7441 = vmatpush3.msra.mxu1 %v7053_v51 }
 0x52e   :  { %v2091_v33 = vpop.trf.xlu1  ;;  %7379 = vmatpush3.msra.mxu0 %v8395_v20  ;;  %v6095_v20 = vcombine.low %v6086_v12, %v6094_v54 }
 0x52f   :  { %v5971_v17 = vcombine.low %v2027_v36, %v2091_v33  ;;  %7380 = vmatprep.subr.mxu0 %v8357_v61 }
 0x530   :  { %7381 = vmatpush3.msra.mxu0 %v8357_v61 }
 0x531   :  { %v5978_v57 = vrot.slane %v5971_v17, %v8126_v26  ;;  %7382 = vmatprep.subr.mxu0 %v6145_v3  ;;  %v6746_v26 = vcombine.high %v8676_v4, %v8679_v60  ;;  %v8873_v4 = vld [vmem:[#allocation18_spill] sm:$0xff]  ;;  %v8874_v60 = vld [vmem:[#allocation17_spill] sm:$0xff] }
 0x532   :  { %7383 = vmatpush3.msra.mxu0 %v6145_v3 }
 0x533   :  { %v5987_v39 = vcombine.low %v5970_v37, %v5978_v57  ;;  %7384 = vmatprep.subr.mxu0 %v6095_v20 }
 0x534   :  { %7385 = vmatpush3.msra.mxu0 %v6095_v20 }
 0x535   :  { %7386 = vmatprep.subr.mxu0 %v6045_v53  ;;  %v5994_v31 = vrot.slane %v5987_v39, %v8131_v18 }
 0x536   :  { %7387 = vmatpush3.msra.mxu0 %v6045_v53 }
 0x537   :  { %v5995_v61 = vcombine.low %v5986_v43, %v5994_v31  ;;  %v5996_v23 = vcombine.high %v5986_v43, %v5994_v31 }
 0x539   :  { %7388 = vmatprep.subr.mxu0 %v5995_v61 }
 0x53a   :  { %7389 = vmatpush3.msra.mxu0 %v5995_v61 }
 0x53b   :  { %7391 = vmatmul.mubr.f32.vlgmr.msra.gmra.mxu0 %v7492_v56  ;;  %7396 = vmatprep.subr.mxu0 %v6746_v26 }
 0x53c   :  { %7397 = vmatpush3.msra.mxu0 %v6746_v26  ;;  %7393 = vmatprep.mubr.f32.mxu0 %v7497_v58 }
 0x53d   :  { %7398 = vmatprep.subr.mxu0 %v6696_v41 }
 0x53e   :  { %7399 = vmatpush3.msra.mxu0 %v6696_v41 }
 0x53f   :  { %7394 = vmatmul.mubr.f32.gmra.mxu0 %v7502_v28  ;;  %7400 = vmatprep.subr.mxu0 %v8872_v50 }
 0x540   :  { %7401 = vmatpush3.msra.mxu0 %v8872_v50  ;;  %7428 = vmatprep.mubr.f32.mxu0 %v7490_v21 }
 0x541   :  { %7402 = vmatprep.subr.mxu0 %v8873_v4 }
 0x542   :  { %7403 = vmatpush3.msra.mxu0 %v8873_v4 }
 0x543   :  { %7404 = vmatprep.subr.mxu0 %v8874_v60 }
 0x544   :  { %7405 = vmatpush3.msra.mxu0 %v8874_v60 }
 0x545   :  { %7406 = vmatprep.subr.mxu0 %v8875_v46 }
 0x546   :  { %7407 = vmatpush3.msra.mxu0 %v8875_v46 }
 0x547   :  { %7408 = vmatprep.subr.mxu0 %v8876_v47 }
 0x548   :  { %7409 = vmatpush3.msra.mxu0 %v8876_v47 }
 0x549   :  { %7410 = vmatprep.subr.mxu0 %v8877_v62 }
 0x54a   :  { %7411 = vmatpush3.msra.mxu0 %v8877_v62 }
 0x54b   :  { %7412 = vmatprep.subr.mxu0 %v8878_v30 }
 0x54c   :  { %7413 = vmatpush3.msra.mxu0 %v8878_v30 }
 0x54d   :  { %7414 = vmatprep.subr.mxu0 %v8879_v25 }
 0x54e   :  { %7415 = vmatpush3.msra.mxu0 %v8879_v25 }
 0x54f   :  { %7416 = vmatprep.subr.mxu0 %v8880_v42 }
 0x550   :  { %7417 = vmatpush3.msra.mxu0 %v8880_v42 }
 0x551   :  { %7418 = vmatprep.subr.mxu0 %v8881_v0 }
 0x552   :  { %7419 = vmatpush3.msra.mxu0 %v8881_v0 }
 0x553   :  { %7420 = vmatprep.subr.mxu0 %v6146_v7 }
 0x554   :  { %7421 = vmatpush3.msra.mxu0 %v6146_v7 }
 0x555   :  { %7422 = vmatprep.subr.mxu0 %v6096_v8 }
 0x556   :  { %7423 = vmatpush3.msra.mxu0 %v6096_v8 }
 0x557   :  { %7424 = vmatprep.subr.mxu0 %v8735_v1 }
 0x558   :  { %7425 = vmatpush3.msra.mxu0 %v8735_v1 }
 0x559   :  { %7426 = vmatprep.subr.mxu0 %v5996_v23 }
 0x55a   :  { %7427 = vmatpush3.msra.mxu0 %v5996_v23 }
 0x55b   :  { %7429 = vmatmul.mubr.f32.vlgmr.msra.gmra.mxu0 %v7495_v24 }
 0x55c   :  { %7431 = vmatprep.mubr.f32.mxu0 %v7500_v13 }
 0x55f   :  { %7432 = vmatmul.mubr.f32.gmra.mxu0 %v7505_v15 }
 0x5fb   :  { %v7392_v2 = vpop.f32.mrf.mxu0 }
 0x5fd   :  { %v6845_v6 = vpop.f32.mrf.mxu0 }
 0x5fe   :  { %6981 = vxpose.xlu1.b32.start [1/4] (short) (narrow) %v6845_v6, 8 }
 0x5ff   :  { %v7395_v16 = vpop.f32.mrf.mxu0 }
 0x601   :  { %v6855_v38 = vpop.f32.mrf.mxu0 }
 0x602   :  { %6982 = vxpose.xlu1.b32.cont [2/4] (short) (narrow) %v7392_v2, 8 }
 0x606   :  { %6983 = vxpose.xlu1.b32.cont [3/4] (short) (narrow) %v6855_v38, 8 }
 0x60a   :  { %6984 = vxpose.xlu1.b32.end [4/4] (short) (narrow) %v7395_v16, 8 }
 0x61b   :  { %v7430_v19 = vpop.f32.mrf.mxu0 }
 0x61d   :  { %v6962_v59 = vpop.f32.mrf.mxu0 }
 0x61e   :  { %7013 = vxpose.xlu1.b32.start [1/4] (short) (narrow) %v6962_v59, 8 }
 0x61f   :  { %v7433_v53 = vpop.f32.mrf.mxu0 }
 0x621   :  { %v6972_v1 = vpop.f32.mrf.mxu0 }
 0x622   :  { %7014 = vxpose.xlu1.b32.cont [2/4] (short) (narrow) %v7430_v19, 8 }
 0x626   :  { %7015 = vxpose.xlu1.b32.cont [3/4] (short) (narrow) %v6972_v1, 8 }
 0x62a   :  { %7016 = vxpose.xlu1.b32.end [4/4] (short) (narrow) %v7433_v53, 8 }
 0x67a   :  { %v6997_v63 = vpop.trf.xlu1 }
 0x69a   :  { %v7029_v52 = vpop.trf.xlu1 }
 0x69b   :  { %v7045_v5 = vcombine.low %v6997_v63, %v7029_v52 }
 0x69d   :  { %v7052_v36 = vrot.slane %v7045_v5, %v8131_v18 }
 0x69f   :  { %7443 = vmatmul.mubr.msk.f32.vlgmr.msra.gmra.mxu1 %vm46_vm0, %v7052_v36 }
 0x6a0   :  { %7585 = shalt.err (!%p7582_p4)
}
 0x6a1   :  { %7158 = dma.vmem_to_hbm [thread:$0]  %s7156_s12, 32, %s8835_s11, [#allocation7]   ;;  %v7204_v18 = vld [vmem:[%s8833_s9] ss:$0 sm:$0xff] }
 0x6a2   :  { %s7624_s6 = smov [#allocation4]  }
 0x6a3   :  { %s7145_s16 = sshll.u32 %s7624_s6, 4  ;;  %s7146_s16 = int_to_ptr.vmem [resolvable:$true] %s7145_s16 }
 0x6a4   :  { %s7594_s17 = scalar_lea.vmem %s7146_s16, 32  ;;  %p7599_p6 = scmp.lt.s32.totalorder %s7146_s16, %s7146_s16 }
 0x6a5   :  { %p7595_p5 = scmp.ne.s32.totalorder %s7146_s16, %s7594_s17  ;;  %p7600_p7 = scmp.lt.s32.totalorder %s7594_s17, %s7594_s17 }
 0x6a7   :  { %p7601_p8 = por %p7600_p7, %p7599_p6 }
 0x6a9   :  { %p7602_p9 = pnand %p7601_p8, %p7595_p5 }
 0x75f   :  { %v7126_v49 = vpop.f32.mrf.mxu1 }
 0x760   :  { %v7137_v48 = vadd.f32 %v7204_v18, %v7126_v49 }
 0x761   :  { %v7444_v32 = vpop.f32.mrf.mxu1 }
 0x762   :  { %7138 = vst [vmem:[#allocation4] sm:$0x3] %v7137_v48 }
 0x763   :  { %7605 = shalt.err (!%p7602_p9)
}
 0x764   :  { %7148 = dma.vmem_to_hbm [thread:$0]  %s7146_s16, 32, %s8834_s10, [#allocation5]  }
 0x765   :  { %7614 = dma.done.wait [#allocation5], 32  }
 0x766   :  { %7615 = vsyncadd [#allocation5], 4294967264 }
 0x767   :  { %7616 = dma.done.wait [#allocation7], 32  }
 0x768   :  { %7617 = vsyncadd [#allocation7], 4294967264 }
 0x769   :  { %7165 = vsyncpa [#allocation5], 1 }
 0x76a   :  { %7166 = vsyncpa [#allocation7], 1 }

</bundles_post_ra>
